<compile_context>
chip_gen: v5e
topology: v5e:2x2
jax: 0.10.0
libtpu: 0.0.40
codegen_flags: <defaults>
</compile_context>

<pallas_src>
import functools
import math

import jax
import jax.numpy as jnp
from jax import lax
from jax.experimental import pallas as pl
from jax.experimental.pallas import tpu as pltpu


def _layer_norm(x, w, b, eps=1e-5):
    mean = jnp.mean(x, axis=-1, keepdims=True)
    var = jnp.mean((x - mean) ** 2, axis=-1, keepdims=True)
    return (x - mean) * lax.rsqrt(var + eps) * w + b


# Row indices inside the coalesced (8, 128) per-layer vector slab.
_ROW_BQKV, _ROW_BO, _ROW_LN1W, _ROW_LN1B, _ROW_B2, _ROW_LN2W, _ROW_LN2B = range(7)


def encoder_layer_kernel(x_ref, wqkv_ref, wo_ref, w1_ref, w2_ref, vecs_ref, b1_ref,
                         o_ref, acc_ref, *, num_heads, batch, seq):
    """One grid step == one transformer encoder layer (post-norm, ReLU FFN)."""
    layer = pl.program_id(0)

    # Initialize the resident activation from the input on the first layer.
    @pl.when(layer == 0)
    def _():
        acc_ref[...] = x_ref[...].astype(jnp.float32)

    x = acc_ref[...]                                  # (NS, E) f32, all rows at once
    NS, E = x.shape
    Dh = E // num_heads
    scale = 1.0 / math.sqrt(Dh)

    wqkv = wqkv_ref[0]                                # (E, 3E)  bf16
    wo = wo_ref[0]                                    # (E, E)   bf16
    w1 = w1_ref[0]                                    # (E, F)   bf16 (pre-transposed)
    w2 = w2_ref[0]                                    # (E, F)   bf16 (PyTorch layout)
    vecs = vecs_ref[0]                                # (8, 128) f32
    b1 = b1_ref[0]                                    # (1, F)   f32

    bqkv = vecs[_ROW_BQKV:_ROW_BQKV + 1, :3 * E]      # (1, 3E)
    bo = vecs[_ROW_BO:_ROW_BO + 1, :E]
    ln1w = vecs[_ROW_LN1W:_ROW_LN1W + 1, :E]
    ln1b = vecs[_ROW_LN1B:_ROW_LN1B + 1, :E]
    b2 = vecs[_ROW_B2:_ROW_B2 + 1, :E]
    ln2w = vecs[_ROW_LN2W:_ROW_LN2W + 1, :E]
    ln2b = vecs[_ROW_LN2B:_ROW_LN2B + 1, :E]

    # ---- multi-head self-attention (bf16 weight dots, f32 accumulate) ------
    qkv = jnp.dot(x.astype(jnp.bfloat16), wqkv,
                  preferred_element_type=jnp.float32) + bqkv        # (NS, 3E) f32
    q = qkv[:, 0 * E:1 * E]
    k = qkv[:, 1 * E:2 * E]
    v = qkv[:, 2 * E:3 * E]

    head_outs = []
    for h in range(num_heads):                        # static unroll (2 heads, tiny)
        qh = q[:, h * Dh:(h + 1) * Dh].reshape(batch, seq, Dh)
        kh = k[:, h * Dh:(h + 1) * Dh].reshape(batch, seq, Dh)
        vh = v[:, h * Dh:(h + 1) * Dh].reshape(batch, seq, Dh)
        s = jnp.einsum('bqd,bkd->bqk', qh, kh,
                       preferred_element_type=jnp.float32) * scale  # (N, S, S)
        s = s - jnp.max(s, axis=-1, keepdims=True)
        p = jnp.exp(s)
        p = p * pl.reciprocal(jnp.sum(p, axis=-1, keepdims=True), approx=True)
        ctx = jnp.einsum('bqk,bkd->bqd', p, vh,
                         preferred_element_type=jnp.float32)        # (N, S, Dh)
        head_outs.append(ctx.reshape(batch * seq, Dh))
    attn = jnp.concatenate(head_outs, axis=-1)                      # (NS, E)
    attn = jnp.dot(attn.astype(jnp.bfloat16), wo,
                   preferred_element_type=jnp.float32) + bo

    # residual + LayerNorm 1  (dropout1 == identity in eval mode)
    x = _layer_norm(x + attn, ln1w, ln1b)

    # ---- feed-forward -------------------------------------------------------
    hdn = jnp.maximum(
        jnp.dot(x.astype(jnp.bfloat16), w1,
                preferred_element_type=jnp.float32) + b1, 0.0)      # (NS, F)
    # w2 kept lane-dense as (E, F); contract F on both operands (trans-B form).
    ff = lax.dot_general(hdn.astype(jnp.bfloat16), w2,
                         dimension_numbers=(((1,), (1,)), ((), ())),
                         preferred_element_type=jnp.float32) + b2   # (NS, E)

    # residual + LayerNorm 2  (dropout2 == identity in eval mode)
    x = _layer_norm(x + ff, ln2w, ln2b)

    acc_ref[...] = x
    o_ref[...] = x.astype(o_ref.dtype)   # constant out-block index -> written back once


def pack_encoder_params(layer_params, compute_dtype=jnp.bfloat16):
    """Stack per-layer PyTorch-layout params, pre-transpose to lane-dense
    layouts, cast matmul weights to bf16, and coalesce the small vectors."""
    E = layer_params[0]["ln1w"].shape[0]
    F = layer_params[0]["b1"].shape[0]
    assert 3 * E <= 128, "coalesced-vector slab assumes 3*feature_size <= 128"

    wqkv_t = jnp.stack([p["wqkv"].T for p in layer_params]).astype(compute_dtype)  # (L,E,3E)
    wo_t = jnp.stack([p["wo"].T for p in layer_params]).astype(compute_dtype)      # (L,E,E)
    w1_t = jnp.stack([p["w1"].T for p in layer_params]).astype(compute_dtype)      # (L,E,F)
    w2 = jnp.stack([p["w2"] for p in layer_params]).astype(compute_dtype)          # (L,E,F)

    def pad128(v):
        return jnp.pad(v.astype(jnp.float32), (0, 128 - v.shape[0]))

    vecs = jnp.stack([
        jnp.stack([pad128(p["bqkv"]), pad128(p["bo"]),
                   pad128(p["ln1w"]), pad128(p["ln1b"]),
                   pad128(p["b2"]), pad128(p["ln2w"]), pad128(p["ln2b"]),
                   jnp.zeros((128,), jnp.float32)])
        for p in layer_params])                                                     # (L,8,128)

    b1 = jnp.stack([p["b1"].astype(jnp.float32).reshape(1, F)
                    for p in layer_params])                                         # (L,1,F)

    return {"wqkv_t": wqkv_t, "wo_t": wo_t, "w1_t": w1_t, "w2": w2,
            "vecs": vecs, "b1": b1}


def encoder_fused(x_nse, packed, num_heads):
    """Fused L-layer encoder. x_nse: (batch, seq, feature)."""
    N, S, E = x_nse.shape
    L = packed["wqkv_t"].shape[0]
    F = packed["w1_t"].shape[-1]
    NS = N * S
    x2d = x_nse.reshape(NS, E)

    kernel = functools.partial(encoder_layer_kernel,
                               num_heads=num_heads, batch=N, seq=S)

    grid_spec = pltpu.PrefetchScalarGridSpec(
        num_scalar_prefetch=0,
        grid=(L,),
        in_specs=[
            pl.BlockSpec((NS, E), lambda l: (0, 0)),           # x (read at layer 0)
            pl.BlockSpec((1, E, 3 * E), lambda l: (l, 0, 0)),  # wqkv_t (bf16)
            pl.BlockSpec((1, E, E), lambda l: (l, 0, 0)),      # wo_t   (bf16)
            pl.BlockSpec((1, E, F), lambda l: (l, 0, 0)),      # w1_t   (bf16)
            pl.BlockSpec((1, E, F), lambda l: (l, 0, 0)),      # w2     (bf16)
            pl.BlockSpec((1, 8, 128), lambda l: (l, 0, 0)),    # coalesced vectors
            pl.BlockSpec((1, 1, F), lambda l: (l, 0, 0)),      # b1
        ],
        out_specs=pl.BlockSpec((NS, E), lambda l: (0, 0)),
        scratch_shapes=[pltpu.VMEM((NS, E), jnp.float32)],     # resident activation
    )

    out2d = pl.pallas_call(
        kernel,
        grid_spec=grid_spec,
        out_shape=jax.ShapeDtypeStruct((NS, E), x_nse.dtype),
        compiler_params=pltpu.CompilerParams(
            dimension_semantics=("arbitrary",)),               # layer axis is sequential
    )(x2d, packed["wqkv_t"], packed["wo_t"], packed["w1_t"], packed["w2"],
      packed["vecs"], packed["b1"])
    return out2d.reshape(N, S, E)


def init_layer_params(key, feature_size, dim_feedforward=2048):
    """PyTorch-layout parameters for one TransformerEncoderLayer."""
    E, F = feature_size, dim_feedforward
    ks = jax.random.split(key, 4)
    scale = 0.02
    return {
        "wqkv": scale * jax.random.normal(ks[0], (3 * E, E), jnp.float32),
        "bqkv": jnp.zeros((3 * E,), jnp.float32),
        "wo":   scale * jax.random.normal(ks[1], (E, E), jnp.float32),
        "bo":   jnp.zeros((E,), jnp.float32),
        "ln1w": jnp.ones((E,), jnp.float32),
        "ln1b": jnp.zeros((E,), jnp.float32),
        "w1":   scale * jax.random.normal(ks[2], (F, E), jnp.float32),
        "b1":   jnp.zeros((F,), jnp.float32),
        "w2":   scale * jax.random.normal(ks[3], (E, F), jnp.float32),
        "b2":   jnp.zeros((E,), jnp.float32),
        "ln2w": jnp.ones((E,), jnp.float32),
        "ln2b": jnp.zeros((E,), jnp.float32),
    }


def encoder_forward(x_sne, layer_params, num_heads=2):
    """Equivalent of Encoder.forward: x_sne is (seq, batch, feature)."""
    packed = pack_encoder_params(layer_params)
    x = jnp.transpose(x_sne, (1, 0, 2))      # -> (batch, seq, feature)
    x = encoder_fused(x, packed, num_heads)
    return jnp.transpose(x, (1, 0, 2))       # -> (seq, batch, feature)


if __name__ == "__main__":
    # TODO(synk): dropout(p=0.1) from the PyTorch defaults is not applied
    # (eval-mode / deterministic semantics).
    feature_size = 32
    num_heads = 2
    seq, batch = 8, 2

    key = jax.random.PRNGKey(0)
    kx, k0, k1, k2 = jax.random.split(key, 4)

    x = jax.random.normal(kx, (seq, batch, feature_size), jnp.float32)
    layer_params = [init_layer_params(k, feature_size) for k in (k0, k1, k2)]

    out = encoder_forward(x, layer_params, num_heads=num_heads)
    out = jax.block_until_ready(out)
    assert out.shape == (seq, batch, feature_size)
    print("KERNEL_OK")
</pallas_src>

<mosaic_0001>
module attributes {stable_mosaic.version = 11 : i64} {
  func.func @encoder_layer_kernel(%arg0: i32, %arg1: memref<16x32xf32, #tpu.memory_space<vmem>>, %arg2: memref<1x32x96xbf16, #tpu.memory_space<vmem>>, %arg3: memref<1x32x32xbf16, #tpu.memory_space<vmem>>, %arg4: memref<1x32x2048xbf16, #tpu.memory_space<vmem>>, %arg5: memref<1x32x2048xbf16, #tpu.memory_space<vmem>>, %arg6: memref<1x8x128xf32, #tpu.memory_space<vmem>>, %arg7: memref<1x1x2048xf32, #tpu.memory_space<vmem>>, %arg8: memref<16x32xf32, #tpu.memory_space<vmem>>, %arg9: memref<16x32xf32, #tpu.memory_space<vmem>>) attributes {dimension_semantics = [#tpu.dimension_semantics<arbitrary>], iteration_bounds = array<i64: 3>, scalar_prefetch = 0 : i64, scratch_operands = 1 : i64, tpu.core_type = #tpu.core_type<tc>, window_params = [{pipeline_mode = #tpu.pipeline_mode<synchronous>, transform_indices = @transform_0, window_bounds = array<i64: 16, 32>}, {transform_indices = @transform_1, window_bounds = array<i64: 1, 32, 96>}, {transform_indices = @transform_2, window_bounds = array<i64: 1, 32, 32>}, {transform_indices = @transform_3, window_bounds = array<i64: 1, 32, 2048>}, {transform_indices = @transform_4, window_bounds = array<i64: 1, 32, 2048>}, {transform_indices = @transform_5, window_bounds = array<i64: 1, 8, 128>}, {transform_indices = @transform_6, window_bounds = array<i64: 1, 1, 2048>}, {pipeline_mode = #tpu.pipeline_mode<synchronous>, transform_indices = @transform_7, window_bounds = array<i64: 16, 32>}]} {
    %c0_i32 = arith.constant 0 : i32
    %0 = arith.cmpi eq, %arg0, %c0_i32 : i32
    %1 = arith.extui %0 : i1 to i32
    %c0_i32_0 = arith.constant 0 : i32
    %2 = arith.cmpi ne, %1, %c0_i32_0 : i32
    scf.if %2 {
      %c0_48 = arith.constant 0 : index
      %c0_49 = arith.constant 0 : index
      %135 = vector.load %arg1[%c0_48, %c0_49] : memref<16x32xf32, #tpu.memory_space<vmem>>, vector<16x32xf32>
      %c0_50 = arith.constant 0 : index
      %c0_51 = arith.constant 0 : index
      %136 = vector.load %arg9[%c0_50, %c0_51] : memref<16x32xf32, #tpu.memory_space<vmem>>, vector<16x32xf32>
      tpu.vector_store %arg9[%c0_50, %c0_51], %135 {strides = array<i32>} : memref<16x32xf32, #tpu.memory_space<vmem>>, vector<16x32xf32>,
    } else {
    }
    %c0 = arith.constant 0 : index
    %c0_1 = arith.constant 0 : index
    %3 = vector.load %arg9[%c0, %c0_1] : memref<16x32xf32, #tpu.memory_space<vmem>>, vector<16x32xf32>
    %c0_2 = arith.constant 0 : index
    %c0_3 = arith.constant 0 : index
    %c0_4 = arith.constant 0 : index
    %4 = vector.load %arg2[%c0_2, %c0_3, %c0_4] : memref<1x32x96xbf16, #tpu.memory_space<vmem>>, vector<1x32x96xbf16>
    %5 = vector.shape_cast %4 : vector<1x32x96xbf16> to vector<32x96xbf16>
    %c0_5 = arith.constant 0 : index
    %c0_6 = arith.constant 0 : index
    %c0_7 = arith.constant 0 : index
    %6 = vector.load %arg3[%c0_5, %c0_6, %c0_7] : memref<1x32x32xbf16, #tpu.memory_space<vmem>>, vector<1x32x32xbf16>
    %7 = vector.shape_cast %6 : vector<1x32x32xbf16> to vector<32x32xbf16>
    %c0_8 = arith.constant 0 : index
    %c0_9 = arith.constant 0 : index
    %c0_10 = arith.constant 0 : index
    %8 = vector.load %arg4[%c0_8, %c0_9, %c0_10] : memref<1x32x2048xbf16, #tpu.memory_space<vmem>>, vector<1x32x2048xbf16>
    %9 = vector.shape_cast %8 : vector<1x32x2048xbf16> to vector<32x2048xbf16>
    %c0_11 = arith.constant 0 : index
    %c0_12 = arith.constant 0 : index
    %c0_13 = arith.constant 0 : index
    %10 = vector.load %arg5[%c0_11, %c0_12, %c0_13] : memref<1x32x2048xbf16, #tpu.memory_space<vmem>>, vector<1x32x2048xbf16>
    %11 = vector.shape_cast %10 : vector<1x32x2048xbf16> to vector<32x2048xbf16>
    %c0_14 = arith.constant 0 : index
    %c0_15 = arith.constant 0 : index
    %c0_16 = arith.constant 0 : index
    %12 = vector.load %arg6[%c0_14, %c0_15, %c0_16] : memref<1x8x128xf32, #tpu.memory_space<vmem>>, vector<1x8x128xf32>
    %13 = vector.shape_cast %12 : vector<1x8x128xf32> to vector<8x128xf32>
    %c0_17 = arith.constant 0 : index
    %c0_18 = arith.constant 0 : index
    %c0_19 = arith.constant 0 : index
    %14 = vector.load %arg7[%c0_17, %c0_18, %c0_19] : memref<1x1x2048xf32, #tpu.memory_space<vmem>>, vector<1x1x2048xf32>
    %15 = vector.shape_cast %14 : vector<1x1x2048xf32> to vector<1x2048xf32>
    %16 = vector.extract_strided_slice %13 {offsets = [0, 0], sizes = [1, 96], strides = [1, 1]} : vector<8x128xf32> to vector<1x96xf32>
    %17 = vector.extract_strided_slice %13 {offsets = [1, 0], sizes = [1, 32], strides = [1, 1]} : vector<8x128xf32> to vector<1x32xf32>
    %18 = vector.extract_strided_slice %13 {offsets = [2, 0], sizes = [1, 32], strides = [1, 1]} : vector<8x128xf32> to vector<1x32xf32>
    %19 = vector.extract_strided_slice %13 {offsets = [3, 0], sizes = [1, 32], strides = [1, 1]} : vector<8x128xf32> to vector<1x32xf32>
    %20 = vector.extract_strided_slice %13 {offsets = [4, 0], sizes = [1, 32], strides = [1, 1]} : vector<8x128xf32> to vector<1x32xf32>
    %21 = vector.extract_strided_slice %13 {offsets = [5, 0], sizes = [1, 32], strides = [1, 1]} : vector<8x128xf32> to vector<1x32xf32>
    %22 = vector.extract_strided_slice %13 {offsets = [6, 0], sizes = [1, 32], strides = [1, 1]} : vector<8x128xf32> to vector<1x32xf32>
    %23 = arith.truncf %3 : vector<16x32xf32> to vector<16x32xbf16>
    %cst = arith.constant dense<0.000000e+00> : vector<16x96xf32>
    %24 = tpu.matmul %23, %5, %cst {dimension_numbers = #tpu.dot_dimension_numbers<[1], [0], [0], [1], [0, 0, 1, 1], [], []>} : vector<16x32xbf16>, vector<32x96xbf16>, vector<16x96xf32> -> vector<16x96xf32>
    %25 = vector.broadcast %16 : vector<1x96xf32> to vector<16x96xf32>
    %26 = arith.addf %24, %25 : vector<16x96xf32>
    %27 = vector.extract_strided_slice %26 {offsets = [0, 0], sizes = [16, 32], strides = [1, 1]} : vector<16x96xf32> to vector<16x32xf32>
    %28 = vector.extract_strided_slice %26 {offsets = [0, 32], sizes = [16, 32], strides = [1, 1]} : vector<16x96xf32> to vector<16x32xf32>
    %29 = vector.extract_strided_slice %26 {offsets = [0, 64], sizes = [16, 32], strides = [1, 1]} : vector<16x96xf32> to vector<16x32xf32>
    %30 = vector.extract_strided_slice %27 {offsets = [0, 0], sizes = [16, 16], strides = [1, 1]} : vector<16x32xf32> to vector<16x16xf32>
    %31 = vector.shape_cast %30 : vector<16x16xf32> to vector<2x8x16xf32>
    %32 = vector.extract_strided_slice %28 {offsets = [0, 0], sizes = [16, 16], strides = [1, 1]} : vector<16x32xf32> to vector<16x16xf32>
    %33 = vector.shape_cast %32 : vector<16x16xf32> to vector<2x8x16xf32>
    %34 = vector.extract_strided_slice %29 {offsets = [0, 0], sizes = [16, 16], strides = [1, 1]} : vector<16x32xf32> to vector<16x16xf32>
    %35 = vector.shape_cast %34 : vector<16x16xf32> to vector<2x8x16xf32>
    "tpu.trace_start"() <{level = 10 : i32, message = "bqd,bkd->bqk"}> : () -> ()
    %cst_20 = arith.constant dense<0.000000e+00> : vector<2x8x8xf32>
    %36 = tpu.matmul %31, %33, %cst_20 {dimension_numbers = #tpu.dot_dimension_numbers<[2], [2], [1], [1], [0, 0, 0, 1, 1, 1], [0], [0]>} : vector<2x8x16xf32>, vector<2x8x16xf32>, vector<2x8x8xf32> -> vector<2x8x8xf32>
    "tpu.trace_stop"() : () -> ()
    %cst_21 = arith.constant 2.500000e-01 : f32
    %37 = vector.broadcast %cst_21 : f32 to vector<2x8x8xf32>
    %38 = arith.mulf %36, %37 : vector<2x8x8xf32>
    %cst_22 = arith.constant dense<0xFF800000> : vector<2x8xf32>
    %39 = vector.multi_reduction <maximumf>, %38, %cst_22 [2] : vector<2x8x8xf32> to vector<2x8xf32>
    %40 = vector.shape_cast %39 : vector<2x8xf32> to vector<2x8x1xf32>
    %41 = vector.broadcast %40 : vector<2x8x1xf32> to vector<2x8x8xf32>
    %42 = arith.subf %38, %41 : vector<2x8x8xf32>
    %43 = math.exp %42 : vector<2x8x8xf32>
    %cst_23 = arith.constant dense<0.000000e+00> : vector<2x8xf32>
    %44 = vector.multi_reduction <add>, %43, %cst_23 [2] : vector<2x8x8xf32> to vector<2x8xf32>
    %45 = vector.shape_cast %44 : vector<2x8xf32> to vector<2x8x1xf32>
    %46 = tpu.reciprocal %45 {approx = true} : vector<2x8x1xf32> -> vector<2x8x1xf32>
    %47 = vector.broadcast %46 : vector<2x8x1xf32> to vector<2x8x8xf32>
    %48 = arith.mulf %43, %47 : vector<2x8x8xf32>
    "tpu.trace_start"() <{level = 10 : i32, message = "bqk,bkd->bqd"}> : () -> ()
    %cst_24 = arith.constant dense<0.000000e+00> : vector<2x8x16xf32>
    %49 = tpu.matmul %48, %35, %cst_24 {dimension_numbers = #tpu.dot_dimension_numbers<[2], [1], [1], [2], [0, 0, 0, 1, 1, 2], [0], [0]>} : vector<2x8x8xf32>, vector<2x8x16xf32>, vector<2x8x16xf32> -> vector<2x8x16xf32>
    "tpu.trace_stop"() : () -> ()
    %50 = vector.shape_cast %49 : vector<2x8x16xf32> to vector<16x16xf32>
    %51 = vector.extract_strided_slice %27 {offsets = [0, 16], sizes = [16, 16], strides = [1, 1]} : vector<16x32xf32> to vector<16x16xf32>
    %52 = vector.shape_cast %51 : vector<16x16xf32> to vector<2x8x16xf32>
    %53 = vector.extract_strided_slice %28 {offsets = [0, 16], sizes = [16, 16], strides = [1, 1]} : vector<16x32xf32> to vector<16x16xf32>
    %54 = vector.shape_cast %53 : vector<16x16xf32> to vector<2x8x16xf32>
    %55 = vector.extract_strided_slice %29 {offsets = [0, 16], sizes = [16, 16], strides = [1, 1]} : vector<16x32xf32> to vector<16x16xf32>
    %56 = vector.shape_cast %55 : vector<16x16xf32> to vector<2x8x16xf32>
    "tpu.trace_start"() <{level = 10 : i32, message = "bqd,bkd->bqk"}> : () -> ()
    %cst_25 = arith.constant dense<0.000000e+00> : vector<2x8x8xf32>
    %57 = tpu.matmul %52, %54, %cst_25 {dimension_numbers = #tpu.dot_dimension_numbers<[2], [2], [1], [1], [0, 0, 0, 1, 1, 1], [0], [0]>} : vector<2x8x16xf32>, vector<2x8x16xf32>, vector<2x8x8xf32> -> vector<2x8x8xf32>
    "tpu.trace_stop"() : () -> ()
    %cst_26 = arith.constant 2.500000e-01 : f32
    %58 = vector.broadcast %cst_26 : f32 to vector<2x8x8xf32>
    %59 = arith.mulf %57, %58 : vector<2x8x8xf32>
    %cst_27 = arith.constant dense<0xFF800000> : vector<2x8xf32>
    %60 = vector.multi_reduction <maximumf>, %59, %cst_27 [2] : vector<2x8x8xf32> to vector<2x8xf32>
    %61 = vector.shape_cast %60 : vector<2x8xf32> to vector<2x8x1xf32>
    %62 = vector.broadcast %61 : vector<2x8x1xf32> to vector<2x8x8xf32>
    %63 = arith.subf %59, %62 : vector<2x8x8xf32>
    %64 = math.exp %63 : vector<2x8x8xf32>
    %cst_28 = arith.constant dense<0.000000e+00> : vector<2x8xf32>
    %65 = vector.multi_reduction <add>, %64, %cst_28 [2] : vector<2x8x8xf32> to vector<2x8xf32>
    %66 = vector.shape_cast %65 : vector<2x8xf32> to vector<2x8x1xf32>
    %67 = tpu.reciprocal %66 {approx = true} : vector<2x8x1xf32> -> vector<2x8x1xf32>
    %68 = vector.broadcast %67 : vector<2x8x1xf32> to vector<2x8x8xf32>
    %69 = arith.mulf %64, %68 : vector<2x8x8xf32>
    "tpu.trace_start"() <{level = 10 : i32, message = "bqk,bkd->bqd"}> : () -> ()
    %cst_29 = arith.constant dense<0.000000e+00> : vector<2x8x16xf32>
    %70 = tpu.matmul %69, %56, %cst_29 {dimension_numbers = #tpu.dot_dimension_numbers<[2], [1], [1], [2], [0, 0, 0, 1, 1, 2], [0], [0]>} : vector<2x8x8xf32>, vector<2x8x16xf32>, vector<2x8x16xf32> -> vector<2x8x16xf32>
    "tpu.trace_stop"() : () -> ()
    %71 = vector.shape_cast %70 : vector<2x8x16xf32> to vector<16x16xf32>
    %72 = tpu.concatenate %50, %71 in 1 : vector<16x16xf32>, vector<16x16xf32> -> vector<16x32xf32>
    %73 = arith.truncf %72 : vector<16x32xf32> to vector<16x32xbf16>
    %cst_30 = arith.constant dense<0.000000e+00> : vector<16x32xf32>
    %74 = tpu.matmul %73, %7, %cst_30 {dimension_numbers = #tpu.dot_dimension_numbers<[1], [0], [0], [1], [0, 0, 1, 1], [], []>} : vector<16x32xbf16>, vector<32x32xbf16>, vector<16x32xf32> -> vector<16x32xf32>
    %75 = vector.broadcast %17 : vector<1x32xf32> to vector<16x32xf32>
    %76 = arith.addf %74, %75 : vector<16x32xf32>
    %77 = arith.addf %3, %76 : vector<16x32xf32>
    %cst_31 = arith.constant dense<0.000000e+00> : vector<16xf32>
    %78 = vector.multi_reduction <add>, %77, %cst_31 [1] : vector<16x32xf32> to vector<16xf32>
    %79 = vector.shape_cast %78 : vector<16xf32> to vector<16x1xf32>
    %cst_32 = arith.constant 3.200000e+01 : f32
    %80 = vector.broadcast %cst_32 : f32 to vector<16x1xf32>
    %81 = arith.divf %79, %80 : vector<16x1xf32>
    %82 = vector.broadcast %81 : vector<16x1xf32> to vector<16x32xf32>
    %83 = arith.subf %77, %82 : vector<16x32xf32>
    %84 = arith.mulf %83, %83 : vector<16x32xf32>
    %cst_33 = arith.constant dense<0.000000e+00> : vector<16xf32>
    %85 = vector.multi_reduction <add>, %84, %cst_33 [1] : vector<16x32xf32> to vector<16xf32>
    %86 = vector.shape_cast %85 : vector<16xf32> to vector<16x1xf32>
    %cst_34 = arith.constant 3.200000e+01 : f32
    %87 = vector.broadcast %cst_34 : f32 to vector<16x1xf32>
    %88 = arith.divf %86, %87 : vector<16x1xf32>
    %89 = vector.broadcast %81 : vector<16x1xf32> to vector<16x32xf32>
    %90 = arith.subf %77, %89 : vector<16x32xf32>
    %cst_35 = arith.constant 9.99999974E-6 : f32
    %91 = vector.broadcast %cst_35 : f32 to vector<16x1xf32>
    %92 = arith.addf %88, %91 : vector<16x1xf32>
    %93 = math.rsqrt %92 : vector<16x1xf32>
    %94 = vector.broadcast %93 : vector<16x1xf32> to vector<16x32xf32>
    %95 = arith.mulf %90, %94 : vector<16x32xf32>
    %96 = vector.broadcast %18 : vector<1x32xf32> to vector<16x32xf32>
    %97 = arith.mulf %95, %96 : vector<16x32xf32>
    %98 = vector.broadcast %19 : vector<1x32xf32> to vector<16x32xf32>
    %99 = arith.addf %97, %98 : vector<16x32xf32>
    %100 = arith.truncf %99 : vector<16x32xf32> to vector<16x32xbf16>
    %cst_36 = arith.constant dense<0.000000e+00> : vector<16x2048xf32>
    %101 = tpu.matmul %100, %9, %cst_36 {dimension_numbers = #tpu.dot_dimension_numbers<[1], [0], [0], [1], [0, 0, 1, 1], [], []>} : vector<16x32xbf16>, vector<32x2048xbf16>, vector<16x2048xf32> -> vector<16x2048xf32>
    %102 = vector.broadcast %15 : vector<1x2048xf32> to vector<16x2048xf32>
    %103 = arith.addf %101, %102 : vector<16x2048xf32>
    %cst_37 = arith.constant 0.000000e+00 : f32
    %104 = vector.broadcast %cst_37 : f32 to vector<16x2048xf32>
    %105 = arith.maximumf %103, %104 : vector<16x2048xf32>
    %106 = arith.truncf %105 : vector<16x2048xf32> to vector<16x2048xbf16>
    %cst_38 = arith.constant dense<0.000000e+00> : vector<16x32xf32>
    %107 = tpu.matmul %106, %11, %cst_38 {dimension_numbers = #tpu.dot_dimension_numbers<[1], [1], [0], [0], [0, 0, 1, 0], [], []>} : vector<16x2048xbf16>, vector<32x2048xbf16>, vector<16x32xf32> -> vector<16x32xf32>
    %108 = vector.broadcast %20 : vector<1x32xf32> to vector<16x32xf32>
    %109 = arith.addf %107, %108 : vector<16x32xf32>
    %110 = arith.addf %99, %109 : vector<16x32xf32>
    %cst_39 = arith.constant dense<0.000000e+00> : vector<16xf32>
    %111 = vector.multi_reduction <add>, %110, %cst_39 [1] : vector<16x32xf32> to vector<16xf32>
    %112 = vector.shape_cast %111 : vector<16xf32> to vector<16x1xf32>
    %cst_40 = arith.constant 3.200000e+01 : f32
    %113 = vector.broadcast %cst_40 : f32 to vector<16x1xf32>
    %114 = arith.divf %112, %113 : vector<16x1xf32>
    %115 = vector.broadcast %114 : vector<16x1xf32> to vector<16x32xf32>
    %116 = arith.subf %110, %115 : vector<16x32xf32>
    %117 = arith.mulf %116, %116 : vector<16x32xf32>
    %cst_41 = arith.constant dense<0.000000e+00> : vector<16xf32>
    %118 = vector.multi_reduction <add>, %117, %cst_41 [1] : vector<16x32xf32> to vector<16xf32>
    %119 = vector.shape_cast %118 : vector<16xf32> to vector<16x1xf32>
    %cst_42 = arith.constant 3.200000e+01 : f32
    %120 = vector.broadcast %cst_42 : f32 to vector<16x1xf32>
    %121 = arith.divf %119, %120 : vector<16x1xf32>
    %122 = vector.broadcast %114 : vector<16x1xf32> to vector<16x32xf32>
    %123 = arith.subf %110, %122 : vector<16x32xf32>
    %cst_43 = arith.constant 9.99999974E-6 : f32
    %124 = vector.broadcast %cst_43 : f32 to vector<16x1xf32>
    %125 = arith.addf %121, %124 : vector<16x1xf32>
    %126 = math.rsqrt %125 : vector<16x1xf32>
    %127 = vector.broadcast %126 : vector<16x1xf32> to vector<16x32xf32>
    %128 = arith.mulf %123, %127 : vector<16x32xf32>
    %129 = vector.broadcast %21 : vector<1x32xf32> to vector<16x32xf32>
    %130 = arith.mulf %128, %129 : vector<16x32xf32>
    %131 = vector.broadcast %22 : vector<1x32xf32> to vector<16x32xf32>
    %132 = arith.addf %130, %131 : vector<16x32xf32>
    %c0_44 = arith.constant 0 : index
    %c0_45 = arith.constant 0 : index
    %133 = vector.load %arg9[%c0_44, %c0_45] : memref<16x32xf32, #tpu.memory_space<vmem>>, vector<16x32xf32>
    tpu.vector_store %arg9[%c0_44, %c0_45], %132 {strides = array<i32>} : memref<16x32xf32, #tpu.memory_space<vmem>>, vector<16x32xf32>,
    %c0_46 = arith.constant 0 : index
    %c0_47 = arith.constant 0 : index
    %134 = vector.load %arg8[%c0_46, %c0_47] : memref<16x32xf32, #tpu.memory_space<vmem>>, vector<16x32xf32>
    tpu.vector_store %arg8[%c0_46, %c0_47], %132 {strides = array<i32>} : memref<16x32xf32, #tpu.memory_space<vmem>>, vector<16x32xf32>,
    return
  }
  func.func @transform_0(%arg0: i32) -> (i32, i32) {
    %c0_i32 = arith.constant 0 : i32
    %c0_i32_0 = arith.constant 0 : i32
    %c0_i32_1 = arith.constant 0 : i32
    return %c0_i32, %c0_i32_0 : i32, i32
  }
  func.func @transform_1(%arg0: i32) -> (i32, i32, i32) {
    %c0_i32 = arith.constant 0 : i32
    %c0_i32_0 = arith.constant 0 : i32
    %c0_i32_1 = arith.constant 0 : i32
    return %arg0, %c0_i32, %c0_i32_0 : i32, i32, i32
  }
  func.func @transform_2(%arg0: i32) -> (i32, i32, i32) {
    %c0_i32 = arith.constant 0 : i32
    %c0_i32_0 = arith.constant 0 : i32
    %c0_i32_1 = arith.constant 0 : i32
    return %arg0, %c0_i32, %c0_i32_0 : i32, i32, i32
  }
  func.func @transform_3(%arg0: i32) -> (i32, i32, i32) {
    %c0_i32 = arith.constant 0 : i32
    %c0_i32_0 = arith.constant 0 : i32
    %c0_i32_1 = arith.constant 0 : i32
    return %arg0, %c0_i32, %c0_i32_0 : i32, i32, i32
  }
  func.func @transform_4(%arg0: i32) -> (i32, i32, i32) {
    %c0_i32 = arith.constant 0 : i32
    %c0_i32_0 = arith.constant 0 : i32
    %c0_i32_1 = arith.constant 0 : i32
    return %arg0, %c0_i32, %c0_i32_0 : i32, i32, i32
  }
  func.func @transform_5(%arg0: i32) -> (i32, i32, i32) {
    %c0_i32 = arith.constant 0 : i32
    %c0_i32_0 = arith.constant 0 : i32
    %c0_i32_1 = arith.constant 0 : i32
    return %arg0, %c0_i32, %c0_i32_0 : i32, i32, i32
  }
  func.func @transform_6(%arg0: i32) -> (i32, i32, i32) {
    %c0_i32 = arith.constant 0 : i32
    %c0_i32_0 = arith.constant 0 : i32
    %c0_i32_1 = arith.constant 0 : i32
    return %arg0, %c0_i32, %c0_i32_0 : i32, i32, i32
  }
  func.func @transform_7(%arg0: i32) -> (i32, i32) {
    %c0_i32 = arith.constant 0 : i32
    %c0_i32_0 = arith.constant 0 : i32
    %c0_i32_1 = arith.constant 0 : i32
    return %c0_i32, %c0_i32_0 : i32, i32
  }
}

</mosaic_0001>

<bundles_post_ra>
// kernel: tpu_custom_call.1
= control target key start
LH: loop header
LB: loop body
LE: loop exit
PB: predicated region body
PF: predicated region fallthrough
CT: control target
= control target key end

     0   :  { %s3508_s0 = inlined_call_operand.hbm [shape: f32[16,32], index: 0, kind: input, shape index: {}]   ;;  %s3509_s1 = inlined_call_operand.hbm [shape: bf16[3,32,96], index: 1, kind: input, shape index: {}]   ;;  %s3510_s2 = inlined_call_operand.hbm [shape: bf16[3,32,32], index: 2, kind: input, shape index: {}]   ;;  %s3511_s3 = inlined_call_operand.hbm [shape: bf16[3,32,2048], index: 3, kind: input, shape index: {}]   ;;  %s3512_s4 = inlined_call_operand.hbm [shape: bf16[3,32,2048], index: 4, kind: input, shape index: {}]   ;;  %s3513_s5 = inlined_call_operand.hbm [shape: f32[3,8,128], index: 5, kind: input, shape index: {}]   ;;  %s3514_s6 = inlined_call_operand.hbm [shape: f32[3,1,2048], index: 6, kind: input, shape index: {}]   ;;  %s3515_s7 = inlined_call_operand.hbm [shape: f32[16,32], index: 7, kind: output, shape index: {}]  }
   0x1   :  { %3523 = sst [smem:[#allocation24_spill]] %s3509_s1 }
   0x2   :  { %3524 = sst [smem:[#allocation25_spill]] %s3511_s3 }
   0x3   :  { %3525 = sst [smem:[#allocation26_spill]] %s3514_s6 }
   0x4   :  { %3526 = sst [smem:[#allocation27_spill]] %s3515_s7 }
   0x5   :  { %12 = vsyncpa [#allocation4], 0 }
   0x6   :  { %13 = vsyncpa [#allocation7], 0 }
   0x7   :  { %15 = vsyncpa [#allocation7 + $0x1], 0 }
   0x8   :  { %16 = vsyncpa [#allocation10], 0 }
   0x9   :  { %18 = vsyncpa [#allocation10 + $0x1], 0 }
   0xa   :  { %19 = vsyncpa [#allocation13], 0 }
   0xb   :  { %21 = vsyncpa [#allocation13 + $0x1], 0 }
   0xc   :  { %22 = vsyncpa [#allocation5], 0  ;;  %s2958_s24 = smov 0   ;;  %s2960_s25 = smov 0  }
   0xd   :  { %s2962_s26 = smov 0   ;;  %s2964_s27 = smov 0  }
   0xe LB: > { %3527 = sst [smem:[#allocation21_spill]] %s2896_s26  ;;  %s2979_s28 = sadd.s32 1, %s2900_s27   ;;  %s2900_s27 = sphi %s2964_s27, %s3545_s27   ;;  %s2896_s26 = sphi %s2962_s26, %s3547_s26   ;;  %s2892_s25 = sphi %s2960_s25, %s3549_s25   ;;  %s2888_s24 = sphi %s2958_s24, %s3548_s24  }
   0xf   : > { %3528 = sst [smem:[#allocation22_spill]] %s2979_s28  ;;  %s56_s29 = sadd.s32 1, %s2896_s26 }
  0x10   : > { %s53_s30 = ssub.s32 %s2900_s27, %s2979_s28  ;;  %p63_p0 = scmp.ne.s32.totalorder %s2896_s26, %s2892_s25 }
  0x11   : > { %p54_p1 = scmp.eq.s32.totalorder %s53_s30, 0  ;;  %p64_p2 = scmp.eq.s32.totalorder %s2900_s27, 0 }
  0x12   : > { %p2523_p3 = scmp.lt.s32.totalorder %s2900_s27, 3  ;;  %s2992_s9 = sand.u32 1, %s2900_s27  }
  0x13   : > { %s2989_s8 = scalar_select %p54_p1, %s2896_s26, %s56_s29  }
  0x14   : > { %p65_p4 = por %p64_p2, %p63_p0  ;;  %s2995_s10 = sand.u32 1, %s2896_s26  }
  0x15   : > { %3529 = sst [smem:[#allocation23_spill]] %s2989_s8  ;;  %s2998_s11 = sshll.u32 %s2995_s10, 4 }
  0x16   : > { %s3001_s12 = sshll.u32 %s2900_s27, 4  ;;  %s3530_s1 = sld [smem:[#allocation24_spill]] }
  0x17   : > { %s262_s17 = scalar_lea.vmem [#allocation6], %s2998_s11  ;;  %p3010_p5 = pnand %p2523_p3, %p65_p4 }
  0x18   : > { %s270_s18 = sshll.u32 %s262_s17, 4  ;;  %s271_s18 = int_to_ptr.vmem [resolvable:$true] %s270_s18 }
  0x19   : > { %p3018_p7 = pneg %p3010_p5 }
  0x1c   : > { %s267_s15 = scalar_lea.hbm %s3530_s1, %s3001_s12  ;;  %s2619_s14 = scalar_lea.hbm %s3530_s1, 48 }
  0x1d   : > { %s268_s16 = sshll.u32 %s267_s15, 4  ;;  %s269_s16 = int_to_ptr.hbm [resolvable:$true] %s268_s16 }
  0x1e   : > { %s2612_s22 = sshra.s32 %s269_s16, 4  ;;  %s2613_s22 = int_to_ptr.hbm [resolvable:$true] %s2612_s22 }
  0x1f   : > { %s2614_s23 = scalar_lea.hbm %s2613_s22, 16  ;;  %p2620_p10 = scmp.lt.s32.totalorder %s2613_s22, %s3530_s1 }
  0x20   : > { %p2615_p6 = scmp.ne.s32.totalorder %s2613_s22, %s2614_s23  ;;  %p2621_p11 = scmp.lt.s32.totalorder %s2619_s14, %s2614_s23 }
  0x22   : > { %p2617_p8 = pnand %p3018_p7, %p2615_p6  ;;  %p2622_p12 = por %p2621_p11, %p2620_p10 }
  0x24   : > { %p2618_p9 = pneg %p2617_p8 }
  0x26   : > { %p2623_p13 = pnand %p2622_p12, %p2618_p9 }
  0x28   : > { %2626 = shalt.err (!%p2623_p13)
}
  0x29   : > { %s2902_s20 = smov 64   ;;  %s3519_s21 = smov 4  }
  0x2a   : > { %s3533_s30 = scalar_lea.sflag [#allocation7], %s2992_s9  ;;  %s2409_s13 = sshll.u32 %s2900_s27, 8 }
  0x2b   : > { %2506 = dma.hbm_to_vmem [thread:$0]  (!%p3010_p5), %s269_s16, 256, %s271_s18, %s3533_s30, %s2902_s20, %s2902_s20, %s3519_s21  }
  0x2c   : > { %s3534_s3 = sld [smem:[#allocation25_spill]]  ;;  %s3535_s15 = sshll.u32 %s2995_s10, 8 }
  0x2d   : > { %s306_s17 = scalar_lea.vmem [#allocation9], %s3535_s15  ;;  %s3521_s26 = scalar_lea.sflag [#allocation10], %s2992_s9 }
  0x2e   : > { %s314_s1 = sshll.u32 %s306_s17, 4  ;;  %s315_s1 = int_to_ptr.vmem [resolvable:$true] %s314_s1 }
  0x32   : > { %s311_s14 = scalar_lea.hbm %s3534_s3, %s2409_s13  ;;  %s2649_s30 = scalar_lea.hbm %s3534_s3, 768 }
  0x33   : > { %s312_s8 = sshll.u32 %s311_s14, 4  ;;  %s313_s8 = int_to_ptr.hbm [resolvable:$true] %s312_s8 }
  0x34   : > { %s2642_s28 = sshra.s32 %s313_s8, 4  ;;  %s2643_s28 = int_to_ptr.hbm [resolvable:$true] %s2642_s28 }
  0x35   : > { %s2644_s7 = scalar_lea.hbm %s2643_s28, 256  ;;  %p2650_p3 = scmp.lt.s32.totalorder %s2643_s28, %s3534_s3 }
  0x36   : > { %p2645_p0 = scmp.ne.s32.totalorder %s2643_s28, %s2644_s7  ;;  %p2651_p4 = scmp.lt.s32.totalorder %s2649_s30, %s2644_s7 }
  0x38   : > { %p2647_p1 = pnand %p2645_p0, %p3018_p7  ;;  %p2652_p6 = por %p2651_p4, %p2650_p3 }
  0x3a   : > { %p2648_p2 = pneg %p2647_p1 }
  0x3c   : > { %p2653_p8 = pnand %p2652_p6, %p2648_p2 }
  0x3e   : > { %2656 = shalt.err (!%p2653_p8)
}
  0x3f   : > { %s2904_s14 = smov 1024   ;;  %s333_s7 = scalar_lea.hbm %s3512_s4, %s2409_s13 }
  0x40   : > { %2512 = dma.hbm_to_vmem [thread:$0]  (!%p3010_p5), %s313_s8, 4096, %s315_s1, %s3521_s26, %s2904_s14, %s2904_s14, %s2902_s20  }
  0x41   : > { %s334_s28 = sshll.u32 %s333_s7, 4  ;;  %s3536_s16 = sshll.u32 %s2995_s10, 8  ;;  %s3064_s28 = int_to_ptr.hbm [resolvable:$true] %s334_s28 }
  0x42   : > { %s328_s18 = scalar_lea.vmem [#allocation11], %s3536_s16  ;;  %s2088_s22 = sshll.u32 %s2995_s10, 3 }
  0x43   : > { %s336_s30 = sshll.u32 %s328_s18, 4  ;;  %s2089_s23 = sshll.u32 %s2900_s27, 3  ;;  %s3066_s30 = int_to_ptr.vmem [resolvable:$true] %s336_s30 }
  0x44   : > { %s354_s6 = scalar_lea.hbm %s3513_s5, %s2089_s23  ;;  %s350_s1 = scalar_lea.vmem [#allocation12], %s2088_s22 }
  0x45   : > { %s358_s8 = sshll.u32 %s350_s1, 4  ;;  %s356_s26 = sshll.u32 %s354_s6, 4  ;;  %s359_s8 = int_to_ptr.vmem [resolvable:$true] %s358_s8  ;;  %s357_s26 = int_to_ptr.hbm [resolvable:$true] %s356_s26 }
  0x46   : > { %s3522_s13 = scalar_lea.sflag [#allocation13], %s2992_s9  ;;  %s2672_s15 = sshra.s32 %s357_s26, 4  ;;  %s2673_s15 = int_to_ptr.hbm [resolvable:$true] %s2672_s15 }
  0x47   : > { %s2674_s17 = scalar_lea.hbm %s2673_s15, 8  ;;  %s2679_s16 = scalar_lea.hbm %s3513_s5, 24 }
  0x48   : > { %p2675_p9 = scmp.ne.s32.totalorder %s2673_s15, %s2674_s17  ;;  %p2680_p12 = scmp.lt.s32.totalorder %s2673_s15, %s3513_s5 }
  0x49   : > { %p2681_p13 = scmp.lt.s32.totalorder %s2679_s16, %s2674_s17 }
  0x4a   : > { %p2677_p10 = pnand %p2675_p9, %p3018_p7 }
  0x4b   : > { %p2682_p0 = por %p2681_p13, %p2680_p12 }
  0x4c   : > { %p2678_p11 = pneg %p2677_p10 }
  0x4e   : > { %p2683_p1 = pnand %p2682_p0, %p2678_p11 }
  0x50   : > { %2686 = shalt.err (!%p2683_p1)
}
  0x51   : > { %2518 = dma.hbm_to_vmem [thread:$0]  (!%p3010_p5), %s357_s26, 128, %s359_s8, %s3522_s13  }
  0x52   : > { %s3087_s6 = sadd.s32 4294967295, %s2900_s27   ;;  %p69_p2 = scmp.ne.s32.totalorder %s2892_s25, %s2888_s24 }
  0x53   : > { %p70_p3 = scmp.eq.s32.totalorder %s3087_s6, 0  ;;  %p2073_p4 = scmp.ge.s32.totalorder %s2900_s27, 1 }
  0x54   : > { %p231_p6 = scmp.lt.s32.totalorder %s2900_s27, 4  ;;  %p2074_p9 = scmp.ne.s32.totalorder %s3087_s6, 0 }
  0x55   : > { %p3096_p8 = por %p70_p3, %p69_p2  ;;  %s242_s1 = sshll.u32 %s3508_s0, 4  ;;  %s243_s1 = int_to_ptr.hbm [resolvable:$true] %s242_s1 }
  0x56   : > { %p3101_p10 = pnand %p2073_p4, %p231_p6  ;;  %s2905_s24 = smov [#allocation3]  }
  0x57   : > { %s244_s27 = sshll.u32 %s2905_s24, 4  ;;  %s289_s17 = scalar_lea.hbm %s3510_s2, %s3001_s12  ;;  %s245_s27 = int_to_ptr.vmem [resolvable:$true] %s244_s27 }
  0x58   : > { %p2499_p11 = pneg %p3101_p10  ;;  %s290_s7 = sshll.u32 %s289_s17, 4  ;;  %s291_s7 = int_to_ptr.hbm [resolvable:$true] %s290_s7 }
  0x59   : > { %s2906_s10 = smov 128   ;;  %s2907_s16 = smov 8  }
  0x5a   : > { %p2500_p12 = pnand %p2499_p11, %p70_p3  ;;  %s284_s18 = scalar_lea.vmem [#allocation8], %s2998_s11 }
  0x5b   : > { %s292_s3 = sshll.u32 %s284_s18, 4  ;;  %s2732_s22 = sshra.s32 %s291_s7, 4  ;;  %s293_s3 = int_to_ptr.vmem [resolvable:$true] %s292_s3  ;;  %s2733_s22 = int_to_ptr.hbm [resolvable:$true] %s2732_s22 }
  0x5c   : > { %2502 = dma.hbm_to_vmem [thread:$0]  (!%p2500_p12), %s243_s1, 256, %s245_s27, [#allocation4], %s2906_s10, %s2906_s10, %s2907_s16  }
  0x5d   : > { %s2734_s23 = scalar_lea.hbm %s2733_s22, 16  ;;  %s2739_s8 = scalar_lea.hbm %s3510_s2, 48 }
  0x5e   : > { %p2735_p13 = scmp.ne.s32.totalorder %s2733_s22, %s2734_s23  ;;  %p2740_p2 = scmp.lt.s32.totalorder %s2733_s22, %s3510_s2 }
  0x5f   : > { %p2741_p4 = scmp.lt.s32.totalorder %s2739_s8, %s2734_s23 }
  0x60   : > { %p2737_p0 = pnand %p2735_p13, %p3018_p7 }
  0x61   : > { %p2742_p6 = por %p2741_p4, %p2740_p2 }
  0x62   : > { %p2738_p1 = pneg %p2737_p0 }
  0x64   : > { %p2743_p11 = pnand %p2742_p6, %p2738_p1 }
  0x66   : > { %2746 = shalt.err (!%p2743_p11)
}
  0x67   : > { %s3539_s1 = smov 4   ;;  %s3540_s27 = scalar_lea.sflag [#allocation7], %s2992_s9 }
  0x68   : > { %2509 = dma.hbm_to_vmem [thread:$0]  (!%p3010_p5), %s291_s7, 256, %s293_s3, %s3540_s27, %s2902_s20, %s2902_s20, %s3539_s1  }
  0x69   : > { %s2762_s13 = sshra.s32 %s3064_s28, 4  ;;  %s2769_s22 = scalar_lea.hbm %s3512_s4, 768  ;;  %s2763_s13 = int_to_ptr.hbm [resolvable:$true] %s2762_s13 }
  0x6a   : > { %s2764_s10 = scalar_lea.hbm %s2763_s13, 256  ;;  %p2770_p1 = scmp.lt.s32.totalorder %s2763_s13, %s3512_s4 }
  0x6b   : > { %p2765_p12 = scmp.ne.s32.totalorder %s2763_s13, %s2764_s10  ;;  %p2771_p2 = scmp.lt.s32.totalorder %s2769_s22, %s2764_s10 }
  0x6d   : > { %p2767_p13 = pnand %p2765_p12, %p3018_p7  ;;  %p2772_p4 = por %p2771_p2, %p2770_p1 }
  0x6f   : > { %p2768_p0 = pneg %p2767_p13 }
  0x71   : > { %p2773_p6 = pnand %p2772_p4, %p2768_p0 }
  0x73   : > { %2776 = shalt.err (!%p2773_p6)
}
  0x74   : > { %s3541_s7 = scalar_lea.sflag [#allocation10], %s2992_s9  ;;  %s3542_s15 = sld [smem:[#allocation26_spill]] }
  0x75   : > { %2515 = dma.hbm_to_vmem [thread:$0]  (!%p3010_p5), %s3064_s28, 4096, %s3066_s30, %s3541_s7, %s2904_s14, %s2904_s14, %s2902_s20  }
  0x76   : > { %s369_s1 = scalar_lea.vmem [#allocation14], %s2998_s11 }
  0x77   : > { %s377_s27 = sshll.u32 %s369_s1, 4  ;;  %s378_s27 = int_to_ptr.vmem [resolvable:$true] %s377_s27 }
  0x7a   : > { %s373_s17 = scalar_lea.hbm %s3542_s15, %s3001_s12  ;;  %s2799_s20 = scalar_lea.hbm %s3542_s15, 48 }
  0x7b   : > { %s375_s13 = sshll.u32 %s373_s17, 4  ;;  %s376_s13 = int_to_ptr.hbm [resolvable:$true] %s375_s13 }
  0x7c   : > { %s2792_s10 = sshra.s32 %s376_s13, 4  ;;  %s2793_s10 = int_to_ptr.hbm [resolvable:$true] %s2792_s10 }
  0x7d   : > { %s2794_s16 = scalar_lea.hbm %s2793_s10, 16  ;;  %p2800_p0 = scmp.lt.s32.totalorder %s2793_s10, %s3542_s15 }
  0x7e   : > { %p2795_p11 = scmp.ne.s32.totalorder %s2793_s10, %s2794_s16  ;;  %p2801_p1 = scmp.lt.s32.totalorder %s2799_s20, %s2794_s16 }
  0x80   : > { %p2797_p12 = pnand %p2795_p11, %p3018_p7  ;;  %p2802_p2 = por %p2801_p1, %p2800_p0 }
  0x82   : > { %p2798_p13 = pneg %p2797_p12 }
  0x84   : > { %p2803_p4 = pnand %p2802_p2, %p2798_p13 }
  0x86   : > { %2806 = shalt.err (!%p2803_p4)
}
  0x87   : > { %s3543_s11 = scalar_lea.sflag [#allocation13], %s2992_s9  ;;  %386 = sbr.rel (%p3101_p10) target bundleno = 2083 (0x823), region = 48 }
  0x88   : > { %2521 = dma.hbm_to_vmem [thread:$0]  (!%p3010_p5), %s376_s13, 256, %s378_s27, %s3543_s11  }
  0x8c   : > { %2867 = dma.done.wait (%p70_p3), [#allocation4], 256  }
  0x8d   : > { %2869 = vsyncadd (%p70_p3), [#allocation4], 4294967040  ;;  %s393_s12 = sand.u32 1, %s3087_s6   ;;  %s395_s29 = sand.u32 1, %s2892_s25  }
  0x8e   : > { %s3175_s30 = sshll.u32 %s395_s29, 4  ;;  %s394_s19 = scalar_lea.sflag [#allocation7], %s393_s12 }
  0x8f   : > { %s397_s9 = scalar_lea.vmem [#allocation6], %s3175_s30 }
  0x90   : > { %2871 = dma.done.wait (%p3096_p8), %s394_s19, 512  }
  0x91   : > { %2873 = vsyncadd (%p3096_p8), %s394_s19, 4294966784  ;;  %s2096_s26 = sshll.u32 %s395_s29, 8  ;;  %s407_s23 = scalar_lea.vmem [#allocation8], %s3175_s30 }
  0x92   : > { %s414_s24 = scalar_lea.sflag [#allocation10], %s393_s12  ;;  %s3183_s7 = scalar_lea.vmem [#allocation9], %s2096_s26 }
  0x93   : > { %2875 = dma.done.wait (%p3096_p8), %s414_s24, 8192  }
  0x94   : > { %2877 = vsyncadd (%p3096_p8), %s414_s24, 4294959104  ;;  %s2098_s3 = sshll.u32 %s395_s29, 3  ;;  %s3189_s8 = scalar_lea.vmem [#allocation11], %s2096_s26 }
  0x95   : > { %s434_s17 = scalar_lea.sflag [#allocation13], %s393_s12  ;;  %s3191_s1 = scalar_lea.vmem [#allocation12], %s2098_s3 }
  0x96   : > { %2879 = dma.done.wait (%p3096_p8), %s434_s17, 384  }
  0x97   : > { %2881 = vsyncadd (%p3096_p8), %s434_s17, 4294966912  ;;  %s447_s27 = scalar_lea.vmem [#allocation14], %s3175_s30  ;;  %503 = sbr.rel (%p2074_p9) target bundleno = 159 (0x9f), region = 80 }
  0x9c   : > { %v504_v0 = vld [vmem:[#allocation3] sm:$0xff]  ;;  %vm506_vm0 = vcmask 261120   ;;  %v505_v1 = vld [vmem:[#allocation3 + $0x8] sm:$0xff] }
  0x9d   : > { %507 = vst.msk [vmem:[#allocation2] sm:$0xff] %vm506_vm0, %v504_v0 }
  0x9e   : > { %508 = vst.msk [vmem:[#allocation2 + $0x8] sm:$0xff] %vm506_vm0, %v505_v1 }
  0x9f PF: > { %v2412_v2 = vld [vmem:[%s397_s9 + $0x8] sm:$0xff]  ;;  %v2411_v3 = vld [vmem:[%s397_s9] sm:$0xff]  ;;  %vm600_vm1 = vcmask 261120   ;;  %s2908_s21 = smov 112   ;;  %s2909_s13 = smov 80   ;;  %vm621_vm2 = vcmask 130048  }
  0xa0   : > { %610 = vmatpush.bf16.msra.mxu0 %v2412_v2  ;;  %v3208_v7 = vld [vmem:[%s3191_s1] sm:$0xff]  ;;  %s2910_s10 = smov 96   ;;  %vm675_vm3 = vcmask 64512   ;;  %s2911_s16 = smov 64  }
  0xa1   : > { %v587_v8 = vperm.slane %v3208_v7, 0  ;;  %s2912_s18 = smov 48   ;;  %s2913_s22 = smov 16  }
  0xa2   : > { %s2915_s20 = smov [#allocation15]   ;;  %s3544_s12 = sld [smem:[#allocation27_spill]] }
  0xa3   : > { %s1898_s14 = sshll.u32 %s2915_s20, 4  ;;  %p2525_p5 = scmp.eq.s32.totalorder %s3087_s6, 2  ;;  %s1899_s14 = int_to_ptr.vmem [resolvable:$true] %s1898_s14 }
  0xa4   : > { %v3200_v4 = vld [vmem:[#allocation2] sm:$0xff]  ;;  %611 = vmatpush.bf16.msra.mxu0 %v2411_v3  ;;  %s2916_s30 = smov 128   ;;  %s2917_s19 = smov 8  }
  0xa5   : > { %v3202_v5 = vld [vmem:[#allocation2 + $0x8] sm:$0xff] }
  0xa6   : > { %v586_v6 = vpack.c.bf16 %v3202_v5, %v3200_v4 }
  0xa8   : > { %2109 = vmatmul.msk.bf16.vlgmr.msra.gmra.mxu0 %vm600_vm1, %v586_v6  ;;  %s1900_s29 = sshll.u32 %s3544_s12, 4  ;;  %s1901_s29 = int_to_ptr.hbm [resolvable:$true] %s1900_s29 }
 0x125   : > { %v613_v9 = vpop.f32.mrf.mxu0 }
 0x126   : > { %v3211_v10 = vadd.f32 %v613_v9, %v587_v8 }
 0x128   : > { %750 = vrot.lane.b32.xlu2 %v3211_v10, %s2908_s21  ;;  %752 = vrot.lane.b32.xlu1 %v3211_v10, %s2909_s13 }
 0x129   : > { %619 = vrot.lane.b32.xlu0 %v3211_v10, %s2910_s10 }
 0x12d   : > { %v615_v11 = vpop.f32.mrf.mxu0 }
 0x12e   : > { %v3216_v12 = vadd.f32 %v615_v11, %v587_v8  ;;  %v2414_v8 = vld [vmem:[%s407_s23 + $0x8] sm:$0xff] }
 0x130   : > { %778 = vrot.lane.b32.xlu2 %v3216_v12, %s2908_s21  ;;  %780 = vrot.lane.b32.xlu1 %v3216_v12, %s2909_s13  ;;  %v2575_v31 = vpack.i.bf16 %v3216_v12, %v3211_v10 }
 0x131   : > { %647 = vrot.lane.b32.xlu0 %v3216_v12, %s2910_s10 }
 0x182   : > { %v751_v14 = vpop.permute.xlu2 %750 }
 0x18a   : > { %v779_v18 = vpop.permute.xlu2 %778 }
 0x19a   : > { %v753_v13 = vpop.permute.xlu1 %752 }
 0x19b   : > { %v620_v15 = vpop.permute.xlu0 %619 }
 0x19c   : > { %2110 = vmatpush.xpose.msk.msra.mxu1 %vm621_vm2, %v620_v15 }
 0x19f   : > { %2111 = vmatmul.msk.f32.vlgmr.msra.gmra.mxu1 %vm621_vm2, %v3211_v10 }
 0x1a0   : > { %2116 = vmatpush.xpose.msk.msrb.mxu1 %vm621_vm2, %v753_v13 }
 0x1a2   : > { %v781_v16 = vpop.permute.xlu1 %780 }
 0x1a3   : > { %v648_v17 = vpop.permute.xlu0 %647  ;;  %2118 = vmatpush.xpose.msk.msra.mxu2 %vm621_vm2, %v781_v16 }
 0x1a4   : > { %2112 = vmatpush.xpose.msk.msrb.mxu0 %vm621_vm2, %v648_v17 }
 0x1a6   : > { %2119 = vmatmul.msk.f32.vlgmr.msra.gmra.mxu2 %vm621_vm2, %v779_v18 }
 0x1a7   : > { %2113 = vmatmul.msk.f32.vlgmr.msrb.gmra.mxu0 %vm621_vm2, %v3216_v12  ;;  %2117 = vmatmul.msk.f32.vlgmr.msrb.gmra.mxu1 %vm621_vm2, %v751_v14  ;;  %v2413_v14 = vld [vmem:[%s407_s23] sm:$0xff] }
 0x1a8   : > { %915 = vmatpush.bf16.msrb.mxu2 %v2414_v8  ;;  %v2416_v8 = vld [vmem:[%s3183_s7 + $0xc] sm:$0xf] }
 0x1ac   : > { %916 = vmatpush.bf16.msrb.mxu2 %v2413_v14  ;;  %v2433_v14 = vld [vmem:[%s3183_s7 + $0x94] sm:$0xf] }
 0x21c   : > { %v643_v19 = vpop.f32.mrf.mxu1 }
 0x21d   : > { %v673_v20 = vmul.f32 0.25, %v643_v19 }
 0x21f   : > { %v676_v21 = vsel %vm675_vm3, %v673_v20, -inf }
 0x220   : > { %677 = vmax.xlane.f32.xlu0 %v676_v21  ;;  %v893_v21 = vperm.slane %v3208_v7, 1 }
 0x224   : > { %v670_v22 = vpop.f32.mrf.mxu0  ;;  %v775_v23 = vpop.f32.mrf.mxu1 }
 0x225   : > { %v674_v24 = vmul.f32 0.25, %v670_v22  ;;  %v806_v25 = vmul.f32 0.25, %v775_v23 }
 0x227   : > { %v808_v26 = vsel %vm675_vm3, %v806_v25, -inf  ;;  %v679_v27 = vsel %vm675_vm3, %v674_v24, -inf }
 0x228   : > { %809 = vmax.xlane.f32.xlu2 %v808_v26  ;;  %680 = vmax.xlane.f32.xlu1 %v679_v27 }
 0x229   : > { %v803_v28 = vpop.f32.mrf.mxu2 }
 0x22a   : > { %v807_v29 = vmul.f32 0.25, %v803_v28 }
 0x22c   : > { %v811_v30 = vsel %vm675_vm3, %v807_v29, -inf }
 0x230   : > { %812 = vmax.xlane.f32.xlu2 %v811_v30  ;;  %v2914_v30 = vmov 32.0  }
 0x248   : > { %2576 = vrot.lane.b32.xlu2 %v2575_v31, %s2911_s16 }
 0x293   : > { %v678_v32 = vpop.xlane.xlu0 %677 }
 0x294   : > { %v682_v33 = vsub.f32 %v673_v20, %v678_v32 }
 0x296   : > { %v684_v34 = vmul.f32 1.442695, %v682_v33 }
 0x298   : > { %2585 = vpow2.f32 %v684_v34 }
 0x29b   : > { %v810_v35 = vpop.xlane.xlu2 %809  ;;  %v681_v36 = vpop.xlane.xlu1 %680 }
 0x29c   : > { %v814_v37 = vsub.f32 %v806_v25, %v810_v35  ;;  %v683_v38 = vsub.f32 %v674_v24, %v681_v36 }
 0x29e   : > { %v2586_v39 = vpop.eup %2585  ;;  %v816_v40 = vmul.f32 1.442695, %v814_v37  ;;  %v686_v41 = vmul.f32 1.442695, %v683_v38 }
 0x29f   : > { %v688_v42 = vsel %vm675_vm3, %v2586_v39, 0.0 }
 0x2a0   : > { %2587 = vpow2.f32 %v816_v40  ;;  %689 = vadd.xlane.f32.xlu0 %v688_v42 }
 0x2a1   : > { %2589 = vpow2.f32 %v686_v41 }
 0x2a3   : > { %v813_v43 = vpop.xlane.xlu2 %812 }
 0x2a4   : > { %v815_v44 = vsub.f32 %v807_v29, %v813_v43 }
 0x2a6   : > { %v2588_v45 = vpop.eup %2587  ;;  %v818_v46 = vmul.f32 1.442695, %v815_v44 }
 0x2a7   : > { %v2590_v47 = vpop.eup %2589  ;;  %v820_v48 = vsel %vm675_vm3, %v2588_v45, 0.0 }
 0x2a8   : > { %2591 = vpow2.f32 %v818_v46  ;;  %v691_v49 = vsel %vm675_vm3, %v2590_v47, 0.0  ;;  %821 = vadd.xlane.f32.xlu0 %v820_v48  ;;  %v2439_v46 = vld [vmem:[%s3183_s7 + $0xbc] sm:$0xf0] }
 0x2a9   : > { %692 = vadd.xlane.f32.xlu1 %v691_v49  ;;  %v2199_v49 = vld [vmem:[%s3183_s7 + $0xc0] sm:$0xf0] }
 0x2ab   : > { %v2577_v50 = vpop.permute.xlu2 %2576 }
 0x2ac   : > { %v2578_v51 = vunpack.i.l.bf16 %v2577_v50  ;;  %v2579_v52 = vunpack.i.h.bf16 %v2577_v50  ;;  %v2205_v50 = vld [vmem:[%s3183_s7 + $0x88] sm:$0xf] }
 0x2ae   : > { %v2592_v53 = vpop.eup %2591  ;;  %719 = vmatpush.msra.mxu3 %v2578_v51  ;;  %v2440_v51 = vld [vmem:[%s3183_s7 + $0xc4] sm:$0xf0] }
 0x2af   : > { %v823_v54 = vsel %vm675_vm3, %v2592_v53, 0.0 }
 0x2b0   : > { %745 = vmatpush.msrb.mxu3 %v2579_v52 }
 0x2b1   : > { %824 = vadd.xlane.f32.xlu1 %v823_v54  ;;  %v2432_v54 = vld [vmem:[%s3183_s7 + $0x8c] sm:$0xf] }
 0x2bc   : > { %830 = vrot.lane.b32.xlu0 %v3211_v10, %s2912_s18 }
 0x2ca   : > { %856 = vrot.lane.b32.xlu1 %v3216_v12, %s2912_s18 }
 0x313   : > { %v690_v55 = vpop.xlane.xlu0 %689 }
 0x314   : > { %2593 = vrcp.f32 %v690_v55  ;;  %v2207_v55 = vld [vmem:[%s3183_s7 + $0xc8] sm:$0xf0] }
 0x31a   : > { %v2594_v56 = vpop.eup %2593 }
 0x31b   : > { %v696_v57 = vmul.f32 %v2594_v56, %v2586_v39  ;;  %v822_v59 = vpop.xlane.xlu0 %821 }
 0x31c   : > { %v693_v58 = vpop.xlane.xlu1 %692 }
 0x31d   : > { %2595 = vrcp.f32 %v693_v58  ;;  %2114 = vmatmul.msk.f32.vlgmr.msra.gmra.mxu3 %vm675_vm3, %v696_v57  ;;  %v2210_v57 = vor.u32 %v2432_v54, %v2207_v55  ;;  %v979_v55 = vperm.slane %v3208_v7, 3 }
 0x31e   : > { %2597 = vrcp.f32 %v822_v59  ;;  %v2133_v59 = vld [vmem:[%s3183_s7] sm:$0xf] }
 0x31f   : > { %1228 = vmatpush.bf16.msra.mxu2 %v2210_v57 }
 0x323   : > { %v2596_v60 = vpop.eup %2595 }
 0x324   : > { %v697_v61 = vmul.f32 %v2596_v60, %v2590_v47  ;;  %v2598_v62 = vpop.eup %2597  ;;  %v825_v1 = vpop.xlane.xlu1 %824  ;;  %v2431_v47 = vld [vmem:[%s3183_s7 + $0x84] sm:$0xf]  ;;  %v2423_v60 = vld [vmem:[%s3183_s7 + $0x3c] sm:$0xf0] }
 0x325   : > { %v828_v63 = vmul.f32 %v2598_v62, %v2588_v45  ;;  %2599 = vrcp.f32 %v825_v1  ;;  %v2197_v45 = vld [vmem:[%s3183_s7 + $0x80] sm:$0xf]  ;;  %v2202_v52 = vor.u32 %v2431_v47, %v2199_v49  ;;  %v2134_v62 = vor.u32 %v2423_v60, %v2133_v59  ;;  %v2424_v1 = vld [vmem:[%s3183_s7 + $0x44] sm:$0xf0] }
 0x326   : > { %2115 = vmatmul.msk.f32.vlgmr.msrb.gmra.mxu3 %vm675_vm3, %v697_v61  ;;  %2601 = vrcp.f32 %v2914_v30  ;;  %v2198_v48 = vor.u32 %v2439_v46, %v2197_v45  ;;  %v2415_v61 = vld [vmem:[%s3183_s7 + $0x4] sm:$0xf]  ;;  %v2229_v59 = vld [vmem:[%s3183_s7 + $0xa0] sm:$0xf] }
 0x327   : > { %v2443_v60 = vld [vmem:[%s3183_s7 + $0xdc] sm:$0xf0] }
 0x328   : > { %1186 = vmatpush.bf16.msra.mxu0 %v2198_v48 }
 0x32b   : > { %v2600_v2 = vpop.eup %2599 }
 0x32c   : > { %v829_v3 = vmul.f32 %v2600_v2, %v2592_v53  ;;  %v2602_v31 = vpop.eup %2601  ;;  %v2206_v53 = vor.u32 %v2440_v51, %v2205_v50  ;;  %1187 = vmatpush.bf16.msra.mxu0 %v2134_v62  ;;  %v976_v51 = vperm.slane %v3208_v7, 2  ;;  %v2237_v62 = vld [vmem:[%s3183_s7 + $0xa8] sm:$0xf] }
 0x32d   : > { %v932_v32 = vmul.f32 32.0, %v2602_v31  ;;  %vm936_vm4 = vweird.f32 %v2602_v31  ;;  %v2444_v7 = vld [vmem:[%s3183_s7 + $0xe4] sm:$0xf0] }
 0x32e   : > { %v831_v0 = vpop.permute.xlu0 %830 }
 0x32f   : > { %851 = vmatpush.msra.mxu3 %v831_v0  ;;  %v933_v33 = vsub.f32 1.0, %v932_v32  ;;  %v2141_v0 = vld [vmem:[%s3183_s7 + $0x8] sm:$0xf]  ;;  %v2151_v32 = vld [vmem:[%s3183_s7 + $0x50] sm:$0xf0] }
 0x330   : > { %2120 = vmatmul.msk.f32.vlgmr.msra.gmra.mxu3 %vm675_vm3, %v828_v63  ;;  %v2135_v63 = vld [vmem:[%s3183_s7 + $0x40] sm:$0xf0] }
 0x331   : > { %v934_v34 = vmul.f32 %v2602_v31, %v933_v33  ;;  %1200 = vmatpush.bf16.msrb.mxu3 %v2202_v52  ;;  %v2157_v33 = vld [vmem:[%s3183_s7 + $0x18] sm:$0xf] }
 0x333   : > { %v935_v35 = vadd.f32 %v2602_v31, %v934_v34  ;;  %v2426_v34 = vld [vmem:[%s3183_s7 + $0x54] sm:$0xf0] }
 0x33c   : > { %v857_v6 = vpop.permute.xlu1 %856 }
 0x33d   : > { %877 = vmatpush.msra.mxu1 %v857_v6  ;;  %v2142_v6 = vor.u32 %v2424_v1, %v2141_v0  ;;  %v2436_v1 = vld [vmem:[%s3183_s7 + $0xac] sm:$0xf] }
 0x33e   : > { %2121 = vmatmul.msk.f32.vlgmr.msra.gmra.mxu1 %vm675_vm3, %v829_v3  ;;  %v2138_v3 = vor.u32 %v2415_v61, %v2135_v63  ;;  %v2435_v61 = vld [vmem:[%s3183_s7 + $0xa4] sm:$0xf] }
 0x33f   : > { %1214 = vmatpush.bf16.msrb.mxu1 %v2206_v53 }
 0x340   : > { %1201 = vmatpush.bf16.msrb.mxu3 %v2138_v3  ;;  %v2230_v3 = vor.u32 %v2443_v60, %v2229_v59  ;;  %v2277_v59 = vld [vmem:[%s3189_s8] sm:$0xf] }
 0x341   : > { %v2455_v60 = vld [vmem:[%s3189_s8 + $0x3c] sm:$0xf0] }
 0x343   : > { %1215 = vmatpush.bf16.msrb.mxu1 %v2142_v6 }
 0x3a0   : > { %v721_v9 = vpop.f32.mrf.mxu3 }
 0x3a9   : > { %v747_v10 = vpop.f32.mrf.mxu3 }
 0x3b3   : > { %v853_v11 = vpop.f32.mrf.mxu3 }
 0x3bb   : > { %v879_v12 = vpop.f32.mrf.mxu1 }
 0x3bc   : > { %v2580_v13 = vpack.i.bf16 %v879_v12, %v853_v11  ;;  %v2213_v12 = vld [vmem:[%s3183_s7 + $0x90] sm:$0xf] }
 0x3be   : > { %2581 = vrot.lane.b32.xlu2 %v2580_v13, %s2913_s22  ;;  %v2441_v13 = vld [vmem:[%s3183_s7 + $0xcc] sm:$0xf0] }
 0x418   : > { %v2582_v15 = vpop.permute.xlu2 %2581 }
 0x419   : > { %v2584_v16 = vunpack.i.h.bf16 %v2582_v15  ;;  %v2583_v17 = vunpack.i.l.bf16 %v2582_v15 }
 0x41b   : > { %v891_v18 = vsel %vm621_vm2, %v747_v10, %v2584_v16  ;;  %v890_v19 = vsel %vm621_vm2, %v721_v9, %v2583_v17  ;;  %v2143_v9 = vld [vmem:[%s3183_s7 + $0x48] sm:$0xf0]  ;;  %v2214_v16 = vor.u32 %v2441_v13, %v2213_v12  ;;  %v2215_v17 = vld [vmem:[%s3183_s7 + $0xd0] sm:$0xf0]  ;;  %v2419_v12 = vld [vmem:[%s3183_s7 + $0x24] sm:$0xf] }
 0x41c   : > { %v892_v20 = vpack.c.bf16 %v891_v18, %v890_v19  ;;  %v2146_v10 = vor.u32 %v2416_v8, %v2143_v9  ;;  %v2221_v18 = vld [vmem:[%s3183_s7 + $0x98] sm:$0xf]  ;;  %v2165_v8 = vld [vmem:[%s3183_s7 + $0x20] sm:$0xf]  ;;  %v2167_v13 = vld [vmem:[%s3183_s7 + $0x60] sm:$0xf0] }
 0x41d   : > { %v2442_v19 = vld [vmem:[%s3183_s7 + $0xd4] sm:$0xf0]  ;;  %1242 = vmatpush.bf16.msrb.mxu0 %v2214_v16  ;;  %v2427_v9 = vld [vmem:[%s3183_s7 + $0x5c] sm:$0xf0]  ;;  %v2420_v16 = vld [vmem:[%s3183_s7 + $0x2c] sm:$0xf] }
 0x41e   : > { %2130 = vmatmul.msk.bf16.vlgmr.msrb.gmra.mxu2 %vm600_vm1, %v892_v20  ;;  %v2218_v20 = vor.u32 %v2433_v14, %v2215_v17  ;;  %v2173_v14 = vld [vmem:[%s3183_s7 + $0x28] sm:$0xf]  ;;  %v2175_v17 = vld [vmem:[%s3183_s7 + $0x68] sm:$0xf0] }
 0x41f   : > { %1229 = vmatpush.bf16.msra.mxu2 %v2146_v10  ;;  %v2238_v10 = vor.u32 %v2444_v7, %v2237_v62  ;;  %v2456_v62 = vld [vmem:[%s3189_s8 + $0x44] sm:$0xf0] }
 0x420   : > { %1256 = vmatpush.bf16.msra.mxu3 %v2218_v20 }
 0x4a1   : > { %v918_v22 = vpop.f32.mrf.mxu2 }
 0x4a2   : > { %v919_v23 = vadd.f32 %v918_v22, %v893_v21  ;;  %v2434_v22 = vld [vmem:[%s3183_s7 + $0x9c] sm:$0xf] }
 0x4a4   : > { %v923_v24 = vadd.f32 %v919_v23, %v3200_v4  ;;  %v3259_v4 = vsel %vm936_vm4, %v2602_v31, %v935_v35  ;;  %v2223_v23 = vld [vmem:[%s3183_s7 + $0xd8] sm:$0xf0] }
 0x4a6   : > { %v925_v25 = vsel %vm600_vm1, %v923_v24, 0.0 }
 0x4a7   : > { %926 = vadd.xlane.f32.xlu0 %v925_v25 }
 0x4a9   : > { %v920_v26 = vpop.f32.mrf.mxu2 }
 0x4aa   : > { %v921_v27 = vadd.f32 %v920_v26, %v893_v21  ;;  %v2222_v21 = vor.u32 %v2442_v19, %v2221_v18  ;;  %v2166_v18 = vor.u32 %v2427_v9, %v2165_v8  ;;  %v2170_v19 = vor.u32 %v2419_v12, %v2167_v13  ;;  %v2357_v9 = vld [vmem:[%s3189_s8 + $0x90] sm:$0xf]  ;;  %v2474_v13 = vld [vmem:[%s3189_s8 + $0xd4] sm:$0xf0] }
 0x4ac   : > { %v924_v28 = vadd.f32 %v921_v27, %v3202_v5  ;;  %v2226_v27 = vor.u32 %v2434_v22, %v2223_v23  ;;  %1270 = vmatpush.bf16.msra.mxu1 %v2222_v21  ;;  %v2178_v21 = vor.u32 %v2420_v16, %v2175_v17  ;;  %v2245_v22 = vld [vmem:[%s3183_s7 + $0xb0] sm:$0xf]  ;;  %v2359_v16 = vld [vmem:[%s3189_s8 + $0xd0] sm:$0xf0]  ;;  %v2466_v17 = vld [vmem:[%s3189_s8 + $0x9c] sm:$0xf] }
 0x4ad   : > { %v2445_v23 = vld [vmem:[%s3183_s7 + $0xec] sm:$0xf0] }
 0x4ae   : > { %v928_v29 = vsel %vm600_vm1, %v924_v28, 0.0  ;;  %1284 = vmatpush.bf16.msrb.mxu2 %v2226_v27  ;;  %v2446_v27 = vld [vmem:[%s3183_s7 + $0xf4] sm:$0xf0] }
 0x4af   : > { %929 = vadd.xlane.f32.xlu2 %v928_v29  ;;  %v2417_v29 = vld [vmem:[%s3183_s7 + $0x14] sm:$0xf] }
 0x4b0   : > { %v2154_v35 = vor.u32 %v2417_v29, %v2151_v32  ;;  %v2255_v29 = vld [vmem:[%s3183_s7 + $0xf8] sm:$0xf0]  ;;  %v2181_v32 = vld [vmem:[%s3183_s7 + $0x30] sm:$0xf] }
 0x4b2   : > { %1257 = vmatpush.bf16.msra.mxu3 %v2154_v35 }
 0x51a   : > { %v927_v36 = vpop.xlane.xlu0 %926 }
 0x51b   : > { %v938_v5 = vmul.f32 %v3259_v4, %v927_v36  ;;  %v2158_v36 = vor.u32 %v2426_v34, %v2157_v33  ;;  %v2429_v33 = vld [vmem:[%s3183_s7 + $0x6c] sm:$0xf0] }
 0x51d   : > { %v3262_v37 = vsub.f32 %v923_v24, %v938_v5  ;;  %v2149_v24 = vld [vmem:[%s3183_s7 + $0x10] sm:$0xf]  ;;  %v2418_v5 = vld [vmem:[%s3183_s7 + $0x1c] sm:$0xf]  ;;  %1271 = vmatpush.bf16.msra.mxu1 %v2158_v36  ;;  %v2421_v36 = vld [vmem:[%s3183_s7 + $0x34] sm:$0xf] }
 0x51f   : > { %v942_v38 = vmul.f32 %v3262_v37, %v3262_v37 }
 0x521   : > { %v944_v39 = vsel %vm600_vm1, %v942_v38, 0.0  ;;  %v2159_v38 = vld [vmem:[%s3183_s7 + $0x58] sm:$0xf0] }
 0x522   : > { %v930_v40 = vpop.xlane.xlu2 %929  ;;  %945 = vadd.xlane.f32.xlu1 %v944_v39 }
 0x523   : > { %v939_v41 = vmul.f32 %v3259_v4, %v930_v40  ;;  %v2162_v40 = vor.u32 %v2418_v5, %v2159_v38  ;;  %v2183_v5 = vld [vmem:[%s3183_s7 + $0x70] sm:$0xf0]  ;;  %v2189_v38 = vld [vmem:[%s3183_s7 + $0x38] sm:$0xf] }
 0x525   : > { %v3268_v42 = vsub.f32 %v924_v28, %v939_v41  ;;  %v2425_v28 = vld [vmem:[%s3183_s7 + $0x4c] sm:$0xf0]  ;;  %1285 = vmatpush.bf16.msrb.mxu2 %v2162_v40  ;;  %v2422_v40 = vld [vmem:[%s3183_s7 + $0x3c] sm:$0xf] }
 0x526   : > { %v2150_v31 = vor.u32 %v2425_v28, %v2149_v24  ;;  %v2437_v24 = vld [vmem:[%s3183_s7 + $0xb4] sm:$0xf]  ;;  %v2438_v28 = vld [vmem:[%s3183_s7 + $0xbc] sm:$0xf] }
 0x527   : > { %v943_v43 = vmul.f32 %v3268_v42, %v3268_v42  ;;  %v2258_v35 = vor.u32 %v2438_v28, %v2255_v29  ;;  %v2295_v28 = vld [vmem:[%s3189_s8 + $0x50] sm:$0xf0]  ;;  %v2450_v29 = vld [vmem:[%s3189_s8 + $0x1c] sm:$0xf] }
 0x528   : > { %1243 = vmatpush.bf16.msrb.mxu0 %v2150_v31 }
 0x529   : > { %v947_v44 = vsel %vm600_vm1, %v943_v43, 0.0 }
 0x52a   : > { %948 = vadd.xlane.f32.xlu0 %v947_v44 }
 0x595   : > { %v946_v56 = vpop.xlane.xlu1 %945 }
 0x596   : > { %v950_v58 = vmul.f32 %v946_v56, %v3259_v4 }
 0x598   : > { %v952_v2 = vadd.f32 1e-05, %v950_v58 }
 0x59a   : > { %2603 = vrsqrt.f32 %v952_v2  ;;  %vm960_vm6 = vweird.f32 %v952_v2 }
 0x59d   : > { %v949_v11 = vpop.xlane.xlu0 %948 }
 0x59e   : > { %v951_v15 = vmul.f32 %v949_v11, %v3259_v4 }
 0x5a0   : > { %v2604_v25 = vpop.eup %2603  ;;  %v953_v26 = vadd.f32 1e-05, %v951_v15  ;;  %v2428_v15 = vld [vmem:[%s3183_s7 + $0x64] sm:$0xf0] }
 0x5a1   : > { %v955_v30 = vmul.f32 %v2604_v25, %v952_v2  ;;  %vm961_vm5 = vweird.f32 %v2604_v25  ;;  %v2174_v20 = vor.u32 %v2428_v15, %v2173_v14  ;;  %v2465_v15 = vld [vmem:[%s3189_s8 + $0x94] sm:$0xf] }
 0x5a2   : > { %2605 = vrsqrt.f32 %v953_v26  ;;  %vm962_vm7 = vmor %vm960_vm6, %vm961_vm5  ;;  %vm970_vm9 = vweird.f32 %v953_v26 }
 0x5a3   : > { %v956_v39 = vmul.f32 %v2604_v25, %v955_v30  ;;  %v2246_v30 = vor.u32 %v2445_v23, %v2245_v22  ;;  %v2457_v22 = vld [vmem:[%s3189_s8 + $0x4c] sm:$0xf0] }
 0x5a5   : > { %v957_v41 = vmul.f32 0.5, %v956_v39  ;;  %v2430_v39 = vld [vmem:[%s3183_s7 + $0x74] sm:$0xf0] }
 0x5a7   : > { %v958_v43 = vsub.f32 1.5, %v957_v41  ;;  %v2191_v41 = vld [vmem:[%s3183_s7 + $0x78] sm:$0xf0] }
 0x5a8   : > { %v2606_v44 = vpop.eup %2605 }
 0x5a9   : > { %v959_v45 = vmul.f32 %v2604_v25, %v958_v43  ;;  %v965_v46 = vmul.f32 %v2606_v44, %v953_v26  ;;  %vm971_vm8 = vweird.f32 %v2606_v44  ;;  %v2253_v26 = vld [vmem:[%s3183_s7 + $0xb8] sm:$0xf]  ;;  %v2182_v43 = vor.u32 %v2429_v33, %v2181_v32  ;;  %v3417_v33 = vld [vmem:[%s447_s27] sm:$0xff] }
 0x5aa   : > { %vm972_vm10 = vmor %vm970_vm9, %vm971_vm8  ;;  %v2254_v34 = vor.u32 %v2446_v27, %v2253_v26  ;;  %v2449_v27 = vld [vmem:[%s3189_s8 + $0x14] sm:$0xf] }
 0x5ab   : > { %v966_v47 = vmul.f32 %v2606_v44, %v965_v46  ;;  %v963_v48 = vsel %vm962_vm7, %v2604_v25, %v959_v45  ;;  %v2247_v25 = vld [vmem:[%s3183_s7 + $0xf0] sm:$0xf0]  ;;  %v2190_v45 = vor.u32 %v2430_v39, %v2189_v38  ;;  %v2194_v46 = vor.u32 %v2422_v40, %v2191_v41 }
 0x5ac   : > { %v974_v52 = vmul.f32 %v963_v48, %v3262_v37  ;;  %v2231_v37 = vld [vmem:[%s3183_s7 + $0xe0] sm:$0xf0]  ;;  %v2250_v31 = vor.u32 %v2437_v24, %v2247_v25  ;;  %v2471_v48 = vld [vmem:[%s3189_s8 + $0xbc] sm:$0xf0]  ;;  %v2301_v24 = vld [vmem:[%s3189_s8 + $0x18] sm:$0xf] }
 0x5ad   : > { %v967_v49 = vmul.f32 0.5, %v966_v47  ;;  %v2234_v6 = vor.u32 %v2435_v61, %v2231_v37  ;;  %v2341_v47 = vld [vmem:[%s3189_s8 + $0x80] sm:$0xf]  ;;  %v2278_v61 = vor.u32 %v2455_v60, %v2277_v59  ;;  %v2285_v37 = vld [vmem:[%s3189_s8 + $0x8] sm:$0xf] }
 0x5ae   : > { %v977_v56 = vmul.f32 %v976_v51, %v974_v52  ;;  %v2286_v7 = vor.u32 %v2456_v62, %v2285_v37  ;;  %v2458_v25 = vld [vmem:[%s3189_s8 + $0x54] sm:$0xf0] }
 0x5af   : > { %v968_v50 = vsub.f32 1.5, %v967_v49  ;;  %v2349_v49 = vld [vmem:[%s3189_s8 + $0x88] sm:$0xf]  ;;  %v2302_v26 = vor.u32 %v2458_v25, %v2301_v24  ;;  %v991_v24 = vperm.slane %v3417_v33, 6 }
 0x5b0   : > { %v3316_v63 = vadd.f32 %v979_v55, %v977_v56  ;;  %v2464_v56 = vld [vmem:[%s3189_s8 + $0x8c] sm:$0xf] }
 0x5b1   : > { %v969_v53 = vmul.f32 %v2606_v44, %v968_v50  ;;  %v2342_v50 = vor.u32 %v2471_v48, %v2341_v47  ;;  %v2373_v47 = vld [vmem:[%s3189_s8 + $0xa0] sm:$0xf] }
 0x5b2   : > { %v2475_v48 = vld [vmem:[%s3189_s8 + $0xdc] sm:$0xf0] }
 0x5b3   : > { %v973_v54 = vsel %vm972_vm10, %v2606_v44, %v969_v53  ;;  %v2186_v44 = vor.u32 %v2421_v36, %v2183_v5  ;;  %v2463_v53 = vld [vmem:[%s3189_s8 + $0x84] sm:$0xf]  ;;  %v985_v36 = vperm.slane %v3417_v33, 0  ;;  %v987_v5 = vperm.slane %v3417_v33, 2 }
 0x5b4   : > { %v975_v57 = vmul.f32 %v973_v54, %v3268_v42  ;;  %v2239_v42 = vld [vmem:[%s3183_s7 + $0xe8] sm:$0xf0]  ;;  %v2343_v54 = vld [vmem:[%s3189_s8 + $0xc0] sm:$0xf0] }
 0x5b5   : > { %v2242_v11 = vor.u32 %v2436_v1, %v2239_v42  ;;  %v2447_v1 = vld [vmem:[%s3189_s8 + $0x4] sm:$0xf] }
 0x5b6   : > { %v978_v58 = vmul.f32 %v976_v51, %v975_v57  ;;  %v2472_v51 = vld [vmem:[%s3189_s8 + $0xc4] sm:$0xf0]  ;;  %v2351_v57 = vld [vmem:[%s3189_s8 + $0xc8] sm:$0xf0]  ;;  %v2279_v42 = vld [vmem:[%s3189_s8 + $0x40] sm:$0xf0] }
 0x5b7   : > { %v2350_v52 = vor.u32 %v2472_v51, %v2349_v49  ;;  %v988_v49 = vperm.slane %v3417_v33, 3  ;;  %v2381_v51 = vld [vmem:[%s3189_s8 + $0xa8] sm:$0xf] }
 0x5b8   : > { %v3318_v0 = vadd.f32 %v979_v55, %v978_v58  ;;  %v2346_v55 = vor.u32 %v2463_v53, %v2343_v54  ;;  %v2354_v58 = vor.u32 %v2464_v56, %v2351_v57  ;;  %v2374_v57 = vor.u32 %v2475_v48, %v2373_v47  ;;  %v2478_v47 = vld [vmem:[%s3189_s8 + $0xf4] sm:$0xf0] }
 0x5ba   : > { %v3325_v2 = vpack.c.bf16 %v3318_v0, %v3316_v63 }
 0x5bc   : > { %2259 = vmatmul.msk.bf16.vlgmr.msra.gmra.mxu0 %vm600_vm1, %v3325_v2  ;;  %2260 = vmatmul.msk.bf16.vlgmr.msrb.gmra.mxu3 %vm600_vm1, %v3325_v2 }
 0x5bd   : > { %2261 = vmatmul.msk.bf16.vlgmr.msrb.gmra.mxu1 %vm600_vm1, %v3325_v2  ;;  %2262 = vmatmul.msk.bf16.vlgmr.msra.gmra.mxu2 %vm600_vm1, %v3325_v2 }
 0x5be   : > { %1298 = vmatpush.bf16.msra.mxu0 %v2230_v3  ;;  %1312 = vmatpush.bf16.msrb.mxu3 %v2234_v6  ;;  %v2282_v3 = vor.u32 %v2447_v1, %v2279_v42  ;;  %v2287_v6 = vld [vmem:[%s3189_s8 + $0x48] sm:$0xf0]  ;;  %v2467_v42 = vld [vmem:[%s3189_s8 + $0xa4] sm:$0xf] }
 0x5bf   : > { %1326 = vmatpush.bf16.msrb.mxu1 %v2238_v10  ;;  %1340 = vmatpush.bf16.msra.mxu2 %v2242_v11  ;;  %v2473_v10 = vld [vmem:[%s3189_s8 + $0xcc] sm:$0xf0]  ;;  %v2365_v11 = vld [vmem:[%s3189_s8 + $0x98] sm:$0xf] }
 0x5c0   : > { %v2358_v12 = vor.u32 %v2473_v10, %v2357_v9  ;;  %v2366_v14 = vor.u32 %v2474_v13, %v2365_v11  ;;  %v2383_v9 = vld [vmem:[%s3189_s8 + $0xe8] sm:$0xf0]  ;;  %v2309_v13 = vld [vmem:[%s3189_s8 + $0x20] sm:$0xf] }
 0x5c2   : > { %1299 = vmatpush.bf16.msra.mxu0 %v2166_v18  ;;  %1313 = vmatpush.bf16.msrb.mxu3 %v2170_v19  ;;  %v2362_v18 = vor.u32 %v2465_v15, %v2359_v16  ;;  %v2367_v19 = vld [vmem:[%s3189_s8 + $0xd8] sm:$0xf0] }
 0x5c3   : > { %1327 = vmatpush.bf16.msrb.mxu1 %v2174_v20  ;;  %1341 = vmatpush.bf16.msra.mxu2 %v2178_v21  ;;  %v2370_v20 = vor.u32 %v2466_v17, %v2367_v19  ;;  %v2293_v21 = vld [vmem:[%s3189_s8 + $0x10] sm:$0xf]  ;;  %v2460_v19 = vld [vmem:[%s3189_s8 + $0x64] sm:$0xf0] }
 0x5c4   : > { %v2294_v23 = vor.u32 %v2457_v22, %v2293_v21  ;;  %v989_v21 = vperm.slane %v3417_v33, 4 }
 0x5cc   : > { %2263 = vmatmul.msk.bf16.vlgmr.msrb.gmra.mxu0 %vm600_vm1, %v3325_v2  ;;  %2264 = vmatmul.msk.bf16.vlgmr.msra.gmra.mxu3 %vm600_vm1, %v3325_v2 }
 0x5cd   : > { %2265 = vmatmul.msk.bf16.vlgmr.msra.gmra.mxu1 %vm600_vm1, %v3325_v2  ;;  %2266 = vmatmul.msk.bf16.vlgmr.msrb.gmra.mxu2 %vm600_vm1, %v3325_v2 }
 0x5ce   : > { %1354 = vmatpush.bf16.msrb.mxu0 %v2246_v30  ;;  %1368 = vmatpush.bf16.msra.mxu3 %v2250_v31  ;;  %v2298_v30 = vor.u32 %v2449_v27, %v2295_v28  ;;  %v2303_v31 = vld [vmem:[%s3189_s8 + $0x58] sm:$0xf0] }
 0x5cf   : > { %1382 = vmatpush.bf16.msra.mxu1 %v2254_v34  ;;  %1396 = vmatpush.bf16.msrb.mxu2 %v2258_v35  ;;  %v2306_v32 = vor.u32 %v2450_v29, %v2303_v31  ;;  %v2311_v31 = vld [vmem:[%s3189_s8 + $0x60] sm:$0xf0] }
 0x5d2   : > { %1355 = vmatpush.bf16.msrb.mxu0 %v2182_v43  ;;  %1369 = vmatpush.bf16.msra.mxu3 %v2186_v44  ;;  %v986_v44 = vperm.slane %v3417_v33, 1 }
 0x5d3   : > { %1383 = vmatpush.bf16.msra.mxu1 %v2190_v45  ;;  %1397 = vmatpush.bf16.msrb.mxu2 %v2194_v46 }
 0x5dc   : > { %2267 = vmatmul.msk.bf16.vlgmr.msra.gmra.mxu0 %vm600_vm1, %v3325_v2  ;;  %2268 = vmatmul.msk.bf16.vlgmr.msrb.gmra.mxu3 %vm600_vm1, %v3325_v2 }
 0x5dd   : > { %2269 = vmatmul.msk.bf16.vlgmr.msrb.gmra.mxu1 %vm600_vm1, %v3325_v2  ;;  %2270 = vmatmul.msk.bf16.vlgmr.msra.gmra.mxu2 %vm600_vm1, %v3325_v2 }
 0x5de   : > { %1619 = vmatpush.bf16.xpose.msra.mxu0 %v2342_v50  ;;  %1647 = vmatpush.bf16.xpose.msrb.mxu1 %v2350_v52  ;;  %v2476_v52 = vld [vmem:[%s3189_s8 + $0xe4] sm:$0xf0] }
 0x5df   : > { %1633 = vmatpush.bf16.xpose.msrb.mxu3 %v2346_v55  ;;  %1661 = vmatpush.bf16.xpose.msra.mxu2 %v2354_v58  ;;  %v2382_v60 = vor.u32 %v2476_v52, %v2381_v51 }
 0x5e6   : > { %1620 = vmatpush.bf16.xpose.msra.mxu0 %v2278_v61  ;;  %1648 = vmatpush.bf16.xpose.msrb.mxu1 %v2286_v7 }
 0x5e7   : > { %1634 = vmatpush.bf16.xpose.msrb.mxu3 %v2282_v3 }
 0x5ec   : > { %2271 = vmatmul.msk.bf16.vlgmr.msrb.gmra.mxu0 %vm600_vm1, %v3325_v2  ;;  %2272 = vmatmul.msk.bf16.vlgmr.msra.gmra.mxu3 %vm600_vm1, %v3325_v2 }
 0x5ed   : > { %2273 = vmatmul.msk.bf16.vlgmr.msra.gmra.mxu1 %vm600_vm1, %v3325_v2  ;;  %2274 = vmatmul.msk.bf16.vlgmr.msrb.gmra.mxu2 %vm600_vm1, %v3325_v2  ;;  %v2448_v2 = vld [vmem:[%s3189_s8 + $0xc] sm:$0xf] }
 0x5ee   : > { %v2290_v8 = vor.u32 %v2448_v2, %v2287_v6  ;;  %1675 = vmatpush.bf16.xpose.msrb.mxu0 %v2358_v12  ;;  %1703 = vmatpush.bf16.xpose.msra.mxu1 %v2366_v14  ;;  %v2375_v2 = vld [vmem:[%s3189_s8 + $0xe0] sm:$0xf0]  ;;  %v2459_v14 = vld [vmem:[%s3189_s8 + $0x5c] sm:$0xf0] }
 0x5ef   : > { %1689 = vmatpush.bf16.xpose.msra.mxu3 %v2362_v18  ;;  %v2378_v17 = vor.u32 %v2467_v42, %v2375_v2  ;;  %v2317_v18 = vld [vmem:[%s3189_s8 + $0x28] sm:$0xf]  ;;  %v2310_v25 = vor.u32 %v2459_v14, %v2309_v13  ;;  %v2470_v42 = vld [vmem:[%s3189_s8 + $0xbc] sm:$0xf]  ;;  %v2333_v14 = vld [vmem:[%s3189_s8 + $0x38] sm:$0xf] }
 0x5f0   : > { %1662 = vmatpush.bf16.xpose.msra.mxu2 %v2290_v8  ;;  %v2468_v8 = vld [vmem:[%s3189_s8 + $0xac] sm:$0xf]  ;;  %v2399_v2 = vld [vmem:[%s3189_s8 + $0xf8] sm:$0xf0] }
 0x5f1   : > { %v2386_v22 = vor.u32 %v2468_v8, %v2383_v9  ;;  %v2325_v9 = vld [vmem:[%s3189_s8 + $0x30] sm:$0xf] }
 0x5f6   : > { %1676 = vmatpush.bf16.xpose.msrb.mxu0 %v2294_v23  ;;  %1704 = vmatpush.bf16.xpose.msra.mxu1 %v2302_v26  ;;  %v2318_v26 = vor.u32 %v2460_v19, %v2317_v18  ;;  %v2402_v18 = vor.u32 %v2470_v42, %v2399_v2 }
 0x5f7   : > { %1690 = vmatpush.bf16.xpose.msra.mxu3 %v2298_v30  ;;  %v2451_v30 = vld [vmem:[%s3189_s8 + $0x24] sm:$0xf] }
 0x5f8   : > { %1717 = vmatpush.bf16.xpose.msrb.mxu2 %v2370_v20 }
 0x600   : > { %1718 = vmatpush.bf16.xpose.msrb.mxu2 %v2306_v32 }
 0x639   : > { %v1189_v34 = vpop.f32.mrf.mxu0 }
 0x63a   : > { %v1217_v35 = vpop.f32.mrf.mxu1  ;;  %v1190_v39 = vadd.f32 %v1189_v34, %v985_v36 }
 0x63b   : > { %v1218_v41 = vadd.f32 %v1217_v35, %v987_v5  ;;  %v2452_v35 = vld [vmem:[%s3189_s8 + $0x2c] sm:$0xf] }
 0x63c   : > { %v1404_v53 = vmax.f32 %v1190_v39, 0.0 }
 0x63d   : > { %v1406_v55 = vmax.f32 %v1218_v41, 0.0  ;;  %v2477_v41 = vld [vmem:[%s3189_s8 + $0xec] sm:$0xf0] }
 0x63f   : > { %v1203_v38 = vpop.f32.mrf.mxu3 }
 0x640   : > { %v1231_v40 = vpop.f32.mrf.mxu2  ;;  %v1204_v58 = vadd.f32 %v1203_v38, %v986_v44 }
 0x641   : > { %v1191_v43 = vpop.f32.mrf.mxu0  ;;  %v1232_v61 = vadd.f32 %v1231_v40, %v988_v49  ;;  %v2389_v40 = vld [vmem:[%s3189_s8 + $0xb0] sm:$0xf] }
 0x642   : > { %v1192_v45 = vadd.f32 %v1191_v43, %v985_v36  ;;  %v1219_v46 = vpop.f32.mrf.mxu1  ;;  %v1405_v10 = vmax.f32 %v1204_v58, 0.0  ;;  %v2319_v36 = vld [vmem:[%s3189_s8 + $0x68] sm:$0xf0]  ;;  %v992_v43 = vperm.slane %v3417_v33, 7 }
 0x643   : > { %v1220_v50 = vadd.f32 %v1219_v46, %v987_v5  ;;  %v1407_v15 = vmax.f32 %v1232_v61, 0.0  ;;  %v990_v5 = vperm.slane %v3417_v33, 5  ;;  %v2397_v46 = vld [vmem:[%s3189_s8 + $0xb8] sm:$0xf]  ;;  %v2469_v61 = vld [vmem:[%s3189_s8 + $0xb4] sm:$0xf] }
 0x644   : > { %v1420_v54 = vmax.f32 %v1192_v45, 0.0  ;;  %v2314_v45 = vor.u32 %v2451_v30, %v2311_v31  ;;  %v2454_v30 = vld [vmem:[%s3189_s8 + $0x3c] sm:$0xf] }
 0x645   : > { %v1422_v56 = vmax.f32 %v1220_v50, 0.0  ;;  %v2322_v50 = vor.u32 %v2452_v35, %v2319_v36  ;;  %v2335_v31 = vld [vmem:[%s3189_s8 + $0x78] sm:$0xf0] }
 0x646   : > { %v1436_v59 = vpack.c.bf16 %v1420_v54, %v1404_v53  ;;  %v2390_v53 = vor.u32 %v2477_v41, %v2389_v40  ;;  %v2338_v41 = vor.u32 %v2454_v30, %v2335_v31 }
 0x647   : > { %v1438_v37 = vpack.c.bf16 %v1422_v56, %v1406_v55  ;;  %v1205_v62 = vpop.f32.mrf.mxu3  ;;  %v2398_v56 = vor.u32 %v2478_v47, %v2397_v46 }
 0x648   : > { %v1206_v7 = vadd.f32 %v1205_v62, %v986_v44  ;;  %v1233_v1 = vpop.f32.mrf.mxu2  ;;  %1621 = vmatmul.bf16.vlgmr.msra.gmra.mxu0 %v1436_v59 }
 0x649   : > { %v1234_v3 = vadd.f32 %v1233_v1, %v988_v49  ;;  %1649 = vmatmul.bf16.vlgmr.msrb.gmra.mxu1 %v1438_v37  ;;  %v1245_v6 = vpop.f32.mrf.mxu0  ;;  %1731 = vmatpush.bf16.xpose.msra.mxu0 %v2374_v57  ;;  %v2391_v37 = vld [vmem:[%s3189_s8 + $0xf0] sm:$0xf0] }
 0x64a   : > { %v1421_v11 = vmax.f32 %v1206_v7, 0.0  ;;  %v1273_v12 = vpop.f32.mrf.mxu1  ;;  %1759 = vmatpush.bf16.xpose.msrb.mxu1 %v2382_v60  ;;  %v1246_v28 = vadd.f32 %v1245_v6, %v989_v21  ;;  %v3451_v7 = vld [vmem:[%s447_s27 + $0x8] sm:$0xff]  ;;  %v2394_v13 = vor.u32 %v2469_v61, %v2391_v37 }
 0x64b   : > { %v1423_v16 = vmax.f32 %v1234_v3, 0.0  ;;  %v1274_v32 = vadd.f32 %v1273_v12, %v991_v24  ;;  %v996_v36 = vperm.slane %v3451_v7, 3  ;;  %v999_v61 = vperm.slane %v3451_v7, 6 }
 0x64c   : > { %v1437_v20 = vpack.c.bf16 %v1421_v11, %v1405_v10  ;;  %v1408_v48 = vmax.f32 %v1246_v28, 0.0  ;;  %v2461_v10 = vld [vmem:[%s3189_s8 + $0x6c] sm:$0xf0] }
 0x64d   : > { %v1439_v23 = vpack.c.bf16 %v1423_v16, %v1407_v15  ;;  %v1410_v51 = vmax.f32 %v1274_v32, 0.0  ;;  %v2462_v15 = vld [vmem:[%s3189_s8 + $0x74] sm:$0xf0]  ;;  %v994_v32 = vperm.slane %v3451_v7, 1 }
 0x64e   : > { %1635 = vmatmul.bf16.vlgmr.msrb.gmra.mxu3 %v1437_v20  ;;  %v995_v20 = vperm.slane %v3451_v7, 2 }
 0x64f   : > { %1663 = vmatmul.bf16.vlgmr.msra.gmra.mxu2 %v1439_v23  ;;  %v1259_v27 = vpop.f32.mrf.mxu3  ;;  %1745 = vmatpush.bf16.xpose.msrb.mxu3 %v2378_v17  ;;  %v993_v17 = vperm.slane %v3451_v7, 0 }
 0x650   : > { %v1287_v29 = vpop.f32.mrf.mxu2  ;;  %1773 = vmatpush.bf16.xpose.msra.mxu2 %v2386_v22  ;;  %v1260_v54 = vadd.f32 %v1259_v27, %v990_v5  ;;  %v2334_v22 = vor.u32 %v2462_v15, %v2333_v14  ;;  %v2327_v27 = vld [vmem:[%s3189_s8 + $0x70] sm:$0xf0] }
 0x651   : > { %v1247_v34 = vpop.f32.mrf.mxu0  ;;  %1732 = vmatpush.bf16.xpose.msra.mxu0 %v2310_v25  ;;  %v1288_v57 = vadd.f32 %v1287_v29, %v992_v43 }
 0x652   : > { %v1248_v38 = vadd.f32 %v1247_v34, %v989_v21  ;;  %v1275_v39 = vpop.f32.mrf.mxu1  ;;  %1760 = vmatpush.bf16.xpose.msrb.mxu1 %v2318_v26  ;;  %v1409_v3 = vmax.f32 %v1260_v54, 0.0  ;;  %v2326_v21 = vor.u32 %v2461_v10, %v2325_v9  ;;  %v2453_v26 = vld [vmem:[%s3189_s8 + $0x34] sm:$0xf]  ;;  %v1000_v9 = vperm.slane %v3451_v7, 7 }
 0x653   : > { %v1276_v44 = vadd.f32 %v1275_v39, %v991_v24  ;;  %v1411_v11 = vmax.f32 %v1288_v57, 0.0 }
 0x654   : > { %v1424_v49 = vmax.f32 %v1248_v38, 0.0  ;;  %v2330_v38 = vor.u32 %v2453_v26, %v2327_v27 }
 0x655   : > { %v1426_v52 = vmax.f32 %v1276_v44, 0.0 }
 0x656   : > { %v1440_v55 = vpack.c.bf16 %v1424_v49, %v1408_v48 }
 0x657   : > { %v1442_v33 = vpack.c.bf16 %v1426_v52, %v1410_v51  ;;  %v1261_v58 = vpop.f32.mrf.mxu3  ;;  %1746 = vmatpush.bf16.xpose.msrb.mxu3 %v2314_v45 }
 0x658   : > { %v1262_v59 = vadd.f32 %v1261_v58, %v990_v5  ;;  %v1289_v60 = vpop.f32.mrf.mxu2  ;;  %1677 = vmatmul.bf16.vlgmr.msrb.gmra.mxu0 %v1440_v55  ;;  %1774 = vmatpush.bf16.xpose.msra.mxu2 %v2322_v50 }
 0x659   : > { %v1290_v62 = vadd.f32 %v1289_v60, %v992_v43  ;;  %1705 = vmatmul.bf16.vlgmr.msra.gmra.mxu1 %v1442_v33  ;;  %v1301_v1 = vpop.f32.mrf.mxu0  ;;  %1787 = vmatpush.bf16.xpose.msrb.mxu0 %v2390_v53 }
 0x65a   : > { %v1425_v6 = vmax.f32 %v1262_v59, 0.0  ;;  %v1329_v8 = vpop.f32.mrf.mxu1  ;;  %1815 = vmatpush.bf16.xpose.msra.mxu1 %v2398_v56  ;;  %v1302_v24 = vadd.f32 %v1301_v1, %v993_v17  ;;  %v997_v59 = vperm.slane %v3451_v7, 4 }
 0x65b   : > { %v1427_v12 = vmax.f32 %v1290_v62, 0.0  ;;  %v1330_v28 = vadd.f32 %v1329_v8, %v995_v20 }
 0x65c   : > { %v1441_v16 = vpack.c.bf16 %v1425_v6, %v1409_v3  ;;  %v1412_v39 = vmax.f32 %v1302_v24, 0.0  ;;  %v998_v3 = vperm.slane %v3451_v7, 5 }
 0x65d   : > { %v1443_v19 = vpack.c.bf16 %v1427_v12, %v1411_v11  ;;  %v1414_v43 = vmax.f32 %v1330_v28, 0.0 }
 0x65e   : > { %1691 = vmatmul.bf16.vlgmr.msra.gmra.mxu3 %v1441_v16 }
 0x65f   : > { %1719 = vmatmul.bf16.vlgmr.msrb.gmra.mxu2 %v1443_v19  ;;  %v1315_v23 = vpop.f32.mrf.mxu3  ;;  %1801 = vmatpush.bf16.xpose.msra.mxu3 %v2394_v13 }
 0x660   : > { %v1343_v25 = vpop.f32.mrf.mxu2  ;;  %1829 = vmatpush.bf16.xpose.msrb.mxu2 %v2402_v18  ;;  %v1316_v45 = vadd.f32 %v1315_v23, %v994_v32 }
 0x661   : > { %v1303_v29 = vpop.f32.mrf.mxu0  ;;  %1788 = vmatpush.bf16.xpose.msrb.mxu0 %v2326_v21  ;;  %v1344_v47 = vadd.f32 %v1343_v25, %v996_v36 }
 0x662   : > { %v1304_v34 = vadd.f32 %v1303_v29, %v993_v17  ;;  %v1331_v35 = vpop.f32.mrf.mxu1  ;;  %1816 = vmatpush.bf16.xpose.msra.mxu1 %v2334_v22  ;;  %v1413_v54 = vmax.f32 %v1316_v45, 0.0 }
 0x663   : > { %v1332_v5 = vadd.f32 %v1331_v35, %v995_v20  ;;  %v1415_v57 = vmax.f32 %v1344_v47, 0.0 }
 0x664   : > { %v1428_v40 = vmax.f32 %v1304_v34, 0.0  ;;  %v3472_v34 = vld [vmem:[%s3191_s1] sm:$0xff] }
 0x665   : > { %v1430_v44 = vmax.f32 %v1332_v5, 0.0  ;;  %v1452_v35 = vperm.slane %v3472_v34, 4 }
 0x666   : > { %v1444_v46 = vpack.c.bf16 %v1428_v40, %v1412_v39 }
 0x667   : > { %v1446_v48 = vpack.c.bf16 %v1430_v44, %v1414_v43  ;;  %v1317_v49 = vpop.f32.mrf.mxu3  ;;  %1802 = vmatpush.bf16.xpose.msra.mxu3 %v2330_v38 }
 0x668   : > { %v1318_v50 = vadd.f32 %v1317_v49, %v994_v32  ;;  %v1345_v51 = vpop.f32.mrf.mxu2  ;;  %1733 = vmatmul.bf16.vlgmr.msra.gmra.mxu0 %v1444_v46  ;;  %1830 = vmatpush.bf16.xpose.msrb.mxu2 %v2338_v41 }
 0x669   : > { %v1346_v52 = vadd.f32 %v1345_v51, %v996_v36  ;;  %1761 = vmatmul.bf16.vlgmr.msrb.gmra.mxu1 %v1446_v48  ;;  %v1357_v53 = vpop.f32.mrf.mxu0 }
 0x66a   : > { %v1429_v55 = vmax.f32 %v1318_v50, 0.0  ;;  %v1385_v56 = vpop.f32.mrf.mxu1  ;;  %v1358_v62 = vadd.f32 %v1357_v53, %v997_v59 }
 0x66b   : > { %v1431_v33 = vmax.f32 %v1346_v52, 0.0  ;;  %v1386_v42 = vadd.f32 %v1385_v56, %v999_v61 }
 0x66c   : > { %v1445_v58 = vpack.c.bf16 %v1429_v55, %v1413_v54  ;;  %v1416_v11 = vmax.f32 %v1358_v62, 0.0 }
 0x66d   : > { %v1447_v60 = vpack.c.bf16 %v1431_v33, %v1415_v57  ;;  %v1418_v13 = vmax.f32 %v1386_v42, 0.0 }
 0x66e   : > { %1747 = vmatmul.bf16.vlgmr.msrb.gmra.mxu3 %v1445_v58 }
 0x66f   : > { %1775 = vmatmul.bf16.vlgmr.msra.gmra.mxu2 %v1447_v60  ;;  %v1371_v37 = vpop.f32.mrf.mxu3 }
 0x670   : > { %v1399_v1 = vpop.f32.mrf.mxu2  ;;  %v1372_v15 = vadd.f32 %v1371_v37, %v998_v3 }
 0x671   : > { %v1359_v2 = vpop.f32.mrf.mxu0  ;;  %v1400_v17 = vadd.f32 %v1399_v1, %v1000_v9 }
 0x672   : > { %v1360_v6 = vadd.f32 %v1359_v2, %v997_v59  ;;  %v1387_v8 = vpop.f32.mrf.mxu1  ;;  %v1417_v23 = vmax.f32 %v1372_v15, 0.0 }
 0x673   : > { %v1388_v10 = vadd.f32 %v1387_v8, %v999_v61  ;;  %v1419_v25 = vmax.f32 %v1400_v17, 0.0 }
 0x674   : > { %v1432_v12 = vmax.f32 %v1360_v6, 0.0 }
 0x675   : > { %v1434_v14 = vmax.f32 %v1388_v10, 0.0 }
 0x676   : > { %v1448_v16 = vpack.c.bf16 %v1432_v12, %v1416_v11 }
 0x677   : > { %v1450_v18 = vpack.c.bf16 %v1434_v14, %v1418_v13  ;;  %v1373_v19 = vpop.f32.mrf.mxu3 }
 0x678   : > { %v1374_v20 = vadd.f32 %v1373_v19, %v998_v3  ;;  %v1401_v21 = vpop.f32.mrf.mxu2  ;;  %1789 = vmatmul.bf16.vlgmr.msrb.gmra.mxu0 %v1448_v16 }
 0x679   : > { %v1402_v22 = vadd.f32 %v1401_v21, %v1000_v9  ;;  %1817 = vmatmul.bf16.vlgmr.msra.gmra.mxu1 %v1450_v18 }
 0x67a   : > { %v1433_v24 = vmax.f32 %v1374_v20, 0.0 }
 0x67b   : > { %v1435_v7 = vmax.f32 %v1402_v22, 0.0 }
 0x67c   : > { %v1449_v26 = vpack.c.bf16 %v1433_v24, %v1417_v23 }
 0x67d   : > { %v1451_v27 = vpack.c.bf16 %v1435_v7, %v1419_v25 }
 0x67e   : > { %1803 = vmatmul.bf16.vlgmr.msra.gmra.mxu3 %v1449_v26 }
 0x67f   : > { %1831 = vmatmul.bf16.vlgmr.msrb.gmra.mxu2 %v1451_v27 }
 0x6c5   : > { %v1622_v28 = vpop.f32.mrf.mxu0 }
 0x6c6   : > { %v1650_v29 = vpop.f32.mrf.mxu1  ;;  %v1623_v38 = vadd.f32 %v1622_v28, %v1452_v35 }
 0x6cd   : > { %v1624_v30 = vpop.f32.mrf.mxu0 }
 0x6ce   : > { %v1652_v31 = vpop.f32.mrf.mxu1  ;;  %v1625_v45 = vadd.f32 %v1624_v30, %v1452_v35 }
 0x6d1   : > { %v1636_v32 = vpop.f32.mrf.mxu3 }
 0x6d2   : > { %v1664_v36 = vpop.f32.mrf.mxu2  ;;  %v1637_v39 = vadd.f32 %v1636_v32, %v1623_v38 }
 0x6d4   : > { %v1651_v44 = vadd.f32 %v1650_v29, %v1637_v39 }
 0x6d5   : > { %v1678_v5 = vpop.f32.mrf.mxu0 }
 0x6d6   : > { %v1706_v40 = vpop.f32.mrf.mxu1  ;;  %v1665_v47 = vadd.f32 %v1664_v36, %v1651_v44 }
 0x6d8   : > { %v1679_v52 = vadd.f32 %v1678_v5, %v1665_v47 }
 0x6d9   : > { %v1638_v41 = vpop.f32.mrf.mxu3 }
 0x6da   : > { %v1666_v43 = vpop.f32.mrf.mxu2  ;;  %v1639_v48 = vadd.f32 %v1638_v41, %v1625_v45 }
 0x6dc   : > { %v1653_v53 = vadd.f32 %v1652_v31, %v1639_v48 }
 0x6dd   : > { %v1680_v46 = vpop.f32.mrf.mxu0 }
 0x6de   : > { %v1708_v51 = vpop.f32.mrf.mxu1  ;;  %v1667_v55 = vadd.f32 %v1666_v43, %v1653_v53 }
 0x6e0   : > { %v1681_v59 = vadd.f32 %v1680_v46, %v1667_v55 }
 0x6e1   : > { %v1692_v49 = vpop.f32.mrf.mxu3 }
 0x6e2   : > { %v1720_v50 = vpop.f32.mrf.mxu2  ;;  %v1693_v54 = vadd.f32 %v1692_v49, %v1679_v52 }
 0x6e4   : > { %v1707_v33 = vadd.f32 %v1706_v40, %v1693_v54 }
 0x6e5   : > { %v1734_v56 = vpop.f32.mrf.mxu0 }
 0x6e6   : > { %v1762_v60 = vpop.f32.mrf.mxu1  ;;  %v1721_v61 = vadd.f32 %v1720_v50, %v1707_v33 }
 0x6e8   : > { %v1735_v1 = vadd.f32 %v1734_v56, %v1721_v61  ;;  %v1883_v61 = vperm.slane %v3472_v34, 5 }
 0x6e9   : > { %v1694_v57 = vpop.f32.mrf.mxu3 }
 0x6ea   : > { %v1722_v58 = vpop.f32.mrf.mxu2  ;;  %v1695_v37 = vadd.f32 %v1694_v57, %v1681_v59 }
 0x6ec   : > { %v1709_v42 = vadd.f32 %v1708_v51, %v1695_v37 }
 0x6ed   : > { %v1736_v3 = vpop.f32.mrf.mxu0 }
 0x6ee   : > { %v1723_v8 = vadd.f32 %v1722_v58, %v1709_v42  ;;  %v1764_v9 = vpop.f32.mrf.mxu1 }
 0x6f0   : > { %v1737_v12 = vadd.f32 %v1736_v3, %v1723_v8 }
 0x6f1   : > { %v1748_v62 = vpop.f32.mrf.mxu3 }
 0x6f2   : > { %v1776_v2 = vpop.f32.mrf.mxu2  ;;  %v1749_v6 = vadd.f32 %v1748_v62, %v1735_v1 }
 0x6f4   : > { %v1763_v10 = vadd.f32 %v1762_v60, %v1749_v6 }
 0x6f5   : > { %v1790_v16 = vpop.f32.mrf.mxu0 }
 0x6f6   : > { %v1777_v14 = vadd.f32 %v1776_v2, %v1763_v10  ;;  %v1818_v19 = vpop.f32.mrf.mxu1 }
 0x6f8   : > { %v1791_v17 = vadd.f32 %v1790_v16, %v1777_v14 }
 0x6f9   : > { %v1750_v11 = vpop.f32.mrf.mxu3 }
 0x6fa   : > { %v1778_v13 = vpop.f32.mrf.mxu2  ;;  %v1751_v15 = vadd.f32 %v1750_v11, %v1737_v12 }
 0x6fc   : > { %v1765_v18 = vadd.f32 %v1764_v9, %v1751_v15 }
 0x6fd   : > { %v1792_v7 = vpop.f32.mrf.mxu0 }
 0x6fe   : > { %v1779_v23 = vadd.f32 %v1778_v13, %v1765_v18  ;;  %v1820_v31 = vpop.f32.mrf.mxu1 }
 0x700   : > { %v1793_v26 = vadd.f32 %v1792_v7, %v1779_v23 }
 0x701   : > { %v1804_v20 = vpop.f32.mrf.mxu3 }
 0x702   : > { %v1805_v21 = vadd.f32 %v1804_v20, %v1791_v17  ;;  %v1832_v22 = vpop.f32.mrf.mxu2 }
 0x704   : > { %v1819_v24 = vadd.f32 %v1818_v19, %v1805_v21 }
 0x706   : > { %v1833_v25 = vadd.f32 %v1832_v22, %v1819_v24 }
 0x708   : > { %v1837_v27 = vadd.f32 %v1833_v25, %v3316_v63 }
 0x709   : > { %v1806_v28 = vpop.f32.mrf.mxu3 }
 0x70a   : > { %v1807_v29 = vadd.f32 %v1806_v28, %v1793_v26  ;;  %v1839_v30 = vsel %vm600_vm1, %v1837_v27, 0.0  ;;  %v1834_v35 = vpop.f32.mrf.mxu2 }
 0x70b   : > { %1840 = vadd.xlane.f32.xlu2 %v1839_v30 }
 0x70c   : > { %v1821_v32 = vadd.f32 %v1820_v31, %v1807_v29 }
 0x70e   : > { %v1835_v36 = vadd.f32 %v1834_v35, %v1821_v32 }
 0x710   : > { %v1838_v5 = vadd.f32 %v1835_v36, %v3318_v0 }
 0x712   : > { %v1842_v38 = vsel %vm600_vm1, %v1838_v5, 0.0 }
 0x713   : > { %1843 = vadd.xlane.f32.xlu1 %v1842_v38 }
 0x77e   : > { %v1841_v39 = vpop.xlane.xlu2 %1840 }
 0x77f   : > { %v1845_v40 = vmul.f32 %v1841_v39, %v3259_v4 }
 0x781   : > { %v1847_v41 = vsub.f32 %v1837_v27, %v1845_v40 }
 0x783   : > { %v1849_v43 = vmul.f32 %v1847_v41, %v1847_v41 }
 0x785   : > { %v1851_v63 = vsel %vm600_vm1, %v1849_v43, 0.0 }
 0x786   : > { %v1844_v44 = vpop.xlane.xlu1 %1843  ;;  %1852 = vadd.xlane.f32.xlu0 %v1851_v63 }
 0x787   : > { %v1846_v45 = vmul.f32 %v1844_v44, %v3259_v4 }
 0x789   : > { %v1848_v46 = vsub.f32 %v1838_v5, %v1846_v45 }
 0x78b   : > { %v1850_v47 = vmul.f32 %v1848_v46, %v1848_v46 }
 0x78d   : > { %v1854_v48 = vsel %vm600_vm1, %v1850_v47, 0.0 }
 0x78e   : > { %1855 = vadd.xlane.f32.xlu2 %v1854_v48 }
 0x7f9   : > { %v1853_v0 = vpop.xlane.xlu0 %1852 }
 0x7fa   : > { %v1857_v49 = vmul.f32 %v1853_v0, %v3259_v4 }
 0x7fc   : > { %v1859_v50 = vadd.f32 1e-05, %v1857_v49 }
 0x7fe   : > { %2607 = vrsqrt.f32 %v1859_v50  ;;  %vm1867_vm12 = vweird.f32 %v1859_v50 }
 0x801   : > { %v1856_v51 = vpop.xlane.xlu2 %1855 }
 0x802   : > { %v1858_v52 = vmul.f32 %v1856_v51, %v3259_v4  ;;  %v1886_v4 = vperm.slane %v3472_v34, 6 }
 0x804   : > { %v2608_v53 = vpop.eup %2607  ;;  %v1860_v54 = vadd.f32 1e-05, %v1858_v52 }
 0x805   : > { %v1862_v55 = vmul.f32 %v2608_v53, %v1859_v50  ;;  %vm1868_vm11 = vweird.f32 %v2608_v53 }
 0x806   : > { %2609 = vrsqrt.f32 %v1860_v54  ;;  %vm1869_vm13 = vmor %vm1867_vm12, %vm1868_vm11  ;;  %vm1877_vm15 = vweird.f32 %v1860_v54 }
 0x807   : > { %v1863_v56 = vmul.f32 %v2608_v53, %v1862_v55 }
 0x809   : > { %v1864_v57 = vmul.f32 0.5, %v1863_v56 }
 0x80b   : > { %v1865_v33 = vsub.f32 1.5, %v1864_v57 }
 0x80c   : > { %v2610_v58 = vpop.eup %2609 }
 0x80d   : > { %v1866_v59 = vmul.f32 %v2608_v53, %v1865_v33  ;;  %v1872_v60 = vmul.f32 %v2610_v58, %v1860_v54  ;;  %vm1878_vm14 = vweird.f32 %v2610_v58 }
 0x80e   : > { %vm1879_vm0 = vmor %vm1877_vm15, %vm1878_vm14 }
 0x80f   : > { %v1870_v37 = vsel %vm1869_vm13, %v2608_v53, %v1866_v59  ;;  %v1873_v62 = vmul.f32 %v2610_v58, %v1872_v60 }
 0x810   : > { %v1881_v1 = vmul.f32 %v1870_v37, %v1847_v41 }
 0x811   : > { %v1874_v42 = vmul.f32 0.5, %v1873_v62 }
 0x812   : > { %v1884_v2 = vmul.f32 %v1883_v61, %v1881_v1 }
 0x813   : > { %v1875_v3 = vsub.f32 1.5, %v1874_v42 }
 0x814   : > { %v1887_v6 = vadd.f32 %v1886_v4, %v1884_v2 }
 0x815   : > { %v1876_v8 = vmul.f32 %v2610_v58, %v1875_v3 }
 0x816   : > { %1889 = vst.msk [vmem:[#allocation2] sm:$0xff] %vm600_vm1, %v1887_v6 }
 0x817   : > { %v1880_v9 = vsel %vm1879_vm0, %v2610_v58, %v1876_v8  ;;  %1891 = vst.msk [vmem:[#allocation15] sm:$0xff] %vm600_vm1, %v1887_v6 }
 0x818   : > { %v1882_v10 = vmul.f32 %v1880_v9, %v1848_v46 }
 0x81a   : > { %v1885_v34 = vmul.f32 %v1883_v61, %v1882_v10 }
 0x81c   : > { %v1888_v11 = vadd.f32 %v1886_v4, %v1885_v34 }
 0x81e   : > { %1890 = vst.msk [vmem:[#allocation2 + $0x8] sm:$0xff] %vm600_vm1, %v1888_v11 }
 0x81f   : > { %1892 = vst.msk [vmem:[#allocation15 + $0x8] sm:$0xff] %vm600_vm1, %v1888_v11 }
 0x820   : > { %2496 = dma.vmem_to_hbm [thread:$0]  (%p2525_p5), %s1899_s14, 256, %s1901_s29, [#allocation5], %s2916_s30, %s2916_s30, %s2917_s19  }
 0x821   : > { %2883 = dma.done.wait (%p2525_p5), [#allocation5], 256  }
 0x822   : > { %2885 = vsyncadd (%p2525_p5), [#allocation5], 4294967040 }
 0x823 PF: > { %s3545_s27 = sld [smem:[#allocation22_spill]]  ;;  %s3548_s24 = smov %s2892_s25 }
 0x824   : > { %s3546_s9 = sld [smem:[#allocation21_spill]] }
 0x825   : > { %s3547_s26 = sld [smem:[#allocation23_spill]] }
 0x829   : > { %p25_p7 = scmp.ge.s32.totalorder %s3545_s27, 5  }
 0x82a   : > { %s3549_s25 = smov %s3546_s9 }
 0x82b   :  { %27 = sbr.rel (!%p25_p7) target bundleno = 14 (0xe), region = 153 }
 0x830   :  { %1917 = vsyncpa [#allocation4], 1 }
 0x831   :  { %1919 = vsyncpa [#allocation4 + $0x1], 1 }
 0x832   :  { %1920 = vsyncpa [#allocation7], 1 }
 0x833   :  { %1922 = vsyncpa [#allocation7 + $0x1], 1 }
 0x834   :  { %1923 = vsyncpa [#allocation10], 1 }
 0x835   :  { %1925 = vsyncpa [#allocation10 + $0x1], 1 }
 0x836   :  { %1926 = vsyncpa [#allocation13], 1 }
 0x837   :  { %1928 = vsyncpa [#allocation13 + $0x1], 1 }
 0x838   :  { %1929 = vsyncpa [#allocation5], 1 }
 0x839   :  { %1931 = vsyncpa [#allocation5 + $0x1], 1 }

</bundles_post_ra>
